<compile_context>
chip_gen: v7x
topology: tpu7x:2x2x1
jax: 0.10.0
libtpu: 0.0.40
codegen_flags: <defaults>
</compile_context>

<pallas_src>
import math

import jax
import jax.numpy as jnp
from jax.experimental import pallas as pl
from jax.experimental.pallas import tpu as pltpu

EPS = 1e-5
LANE = 128

CFG = dict(
    vocab_size=64,
    emb_dim=32,
    context_len=16,
    n_heads=4,
    n_layers=2,
    drop_rate=0.1,
    qkv_bias=True,
)


# --------------------------- in-kernel helpers ------------------------------

def _layernorm(x, w, b):
    # Matches the custom PyTorch LayerNorm exactly:
    # unbiased std (torch.std default), eps added to std (not variance).
    n = x.shape[-1]
    mean = jnp.mean(x, axis=-1, keepdims=True)
    d = x - mean
    var = jnp.sum(d * d, axis=-1, keepdims=True) * (1.0 / (n - 1))
    std = jnp.sqrt(var)
    return d * pl.reciprocal(std + EPS, approx=True) * w + b


def _gelu(x):
    # Exact (erf) GELU -- nn.GELU default.
    return 0.5 * x * (1.0 + jax.lax.erf(x * (1.0 / math.sqrt(2.0))))


# ----------------------------- fused GPT kernel -----------------------------

def _make_gpt_kernel(B, T, H, hd, V):
    E = H * hd
    M = B * T
    scale = 1.0 / math.sqrt(hd)

    def kernel(idx_ref, tok_ref, pos_ref, mask_ref,
               lnf_w_ref, lnf_b_ref, head_ref,
               ln1_w_ref, ln1_b_ref, wqkv_ref, bqkv_ref, wo_ref, bo_ref,
               ln2_w_ref, ln2_b_ref, w1_ref, b1_ref, w2_ref, b2_ref,
               o_ref, x_sc, ctx_sc):
        layer = pl.program_id(0)

        # ---- embedding: first grid step only, result stays resident in VMEM
        @pl.when(layer == 0)
        def _embed():
            idx = idx_ref[...]                                   # (M, 1) int32
            # TODO(synk): for real vocab sizes replace the one-hot matmul with
            # a scalar-prefetched / DMA row gather.
            one_hot = (jax.lax.broadcasted_iota(jnp.int32, (M, V), 1) == idx
                       ).astype(jnp.bfloat16)
            tok = jnp.dot(one_hot, tok_ref[...],
                          preferred_element_type=jnp.float32)    # (M, E) f32
            pos = jnp.broadcast_to(pos_ref[...].reshape(1, T, E),
                                   (B, T, E)).reshape(M, E)      # (M, E)
            x_sc[...] = tok + pos

        # ---- transformer block `layer` -------------------------------------
        x = x_sc[...]                                            # (M, E) f32

        h1 = _layernorm(x, ln1_w_ref[...], ln1_b_ref[...])
        qkv = (jnp.dot(h1.astype(jnp.bfloat16), wqkv_ref[...],
                       preferred_element_type=jnp.float32)
               + bqkv_ref[...])                                  # (M, 3E) f32

        q = qkv[:, 0 * E:1 * E].reshape(B, T, E)
        k = qkv[:, 1 * E:2 * E].reshape(B, T, E)
        v = qkv[:, 2 * E:3 * E].reshape(B, T, E)
        mask_add = mask_ref[...]                                 # (T, T) f32

        for h in range(H):                   # static unroll over heads (H=4)
            c0 = h * hd
            qh = q[:, :, c0:c0 + hd].astype(jnp.bfloat16)        # (B, T, hd)
            kh = k[:, :, c0:c0 + hd].astype(jnp.bfloat16)
            vh = v[:, :, c0:c0 + hd].astype(jnp.bfloat16)
            s = jnp.einsum('bqd,bkd->bqk', qh, kh,
                           preferred_element_type=jnp.float32)   # (B, T, T)
            s = s * scale + mask_add
            s = s - jnp.max(s, axis=-1, keepdims=True)
            p = jnp.exp(s)
            p = p * pl.reciprocal(jnp.sum(p, axis=-1, keepdims=True),
                                  approx=True)
            ctx = jnp.einsum('bqk,bkd->bqd', p.astype(jnp.bfloat16), vh,
                             preferred_element_type=jnp.float32)  # (B, T, hd)
            ctx_sc[:, c0:c0 + hd] = ctx.reshape(M, hd)

        attn = (jnp.dot(ctx_sc[...].astype(jnp.bfloat16), wo_ref[...],
                        preferred_element_type=jnp.float32) + bo_ref[...])
        x = x + attn                                             # residual 1

        h2 = _layernorm(x, ln2_w_ref[...], ln2_b_ref[...])
        ff = (jnp.dot(h2.astype(jnp.bfloat16), w1_ref[...],
                      preferred_element_type=jnp.float32) + b1_ref[...])
        ff = _gelu(ff)
        ff = (jnp.dot(ff.astype(jnp.bfloat16), w2_ref[...],
                      preferred_element_type=jnp.float32) + b2_ref[...])
        x = x + ff                                               # residual 2
        x_sc[...] = x

        # ---- final LN + LM head: last grid step only (lane-dense store) ----
        @pl.when(layer == pl.num_programs(0) - 1)
        def _final():
            hf = _layernorm(x, lnf_w_ref[...], lnf_b_ref[...])
            o_ref[...] = jnp.dot(hf.astype(jnp.bfloat16), head_ref[...],
                                 preferred_element_type=jnp.float32)

    return kernel


# ------------------------------ forward -------------------------------------

def gpt_forward(params, idx):
    B, T = idx.shape
    E = CFG["emb_dim"]
    H = CFG["n_heads"]
    hd = E // H
    V = CFG["vocab_size"]
    L = CFG["n_layers"]
    M = B * T
    Vp = max(LANE, ((V + LANE - 1) // LANE) * LANE)   # lane-dense head output

    idx_flat = idx.reshape(M, 1).astype(jnp.int32)
    pos = params["pos_emb"][:T]                                   # (T, E)
    tri = jnp.arange(T)
    mask_add = jnp.where(tri[None, :] > tri[:, None],
                         -1e30, 0.0).astype(jnp.float32)          # (T, T)
    w_head = jnp.pad(params["w_head"], ((0, 0), (0, Vp - V)))     # (E, Vp)

    def cspec(shape):       # resident across all grid steps (fetched once)
        return pl.BlockSpec(shape, lambda l: (0, 0))

    def lspec(shape):       # stacked per-layer weights, leading L axis squeezed
        return pl.BlockSpec((None,) + shape, lambda l: (l, 0, 0))

    grid_spec = pltpu.PrefetchScalarGridSpec(
        num_scalar_prefetch=0,
        grid=(L,),
        in_specs=[
            cspec((M, 1)),            # idx
            cspec((V, E)),            # tok_emb (bf16)
            cspec((T, E)),            # pos_emb[:T]
            cspec((T, T)),            # additive causal mask
            cspec((1, E)),            # lnf_w
            cspec((1, E)),            # lnf_b
            cspec((E, Vp)),           # padded LM head (bf16)
            lspec((1, E)),            # ln1_w
            lspec((1, E)),            # ln1_b
            lspec((E, 3 * E)),        # wqkv (bf16)
            lspec((1, 3 * E)),        # bqkv
            lspec((E, E)),            # wo (bf16)
            lspec((1, E)),            # bo
            lspec((1, E)),            # ln2_w
            lspec((1, E)),            # ln2_b
            lspec((E, 4 * E)),        # w1 (bf16)
            lspec((1, 4 * E)),        # b1
            lspec((4 * E, E)),        # w2 (bf16)
            lspec((1, E)),            # b2
        ],
        out_specs=pl.BlockSpec((M, Vp), lambda l: (0, 0)),
        scratch_shapes=[pltpu.VMEM((M, E), jnp.float32),   # resident activation
                        pltpu.VMEM((M, E), jnp.float32)],  # attention context
    )

    logits_pad = pl.pallas_call(
        _make_gpt_kernel(B, T, H, hd, V),
        out_shape=jax.ShapeDtypeStruct((M, Vp), jnp.float32),
        grid_spec=grid_spec,
        compiler_params=pltpu.CompilerParams(
            dimension_semantics=("arbitrary",)),
    )(idx_flat, params["tok_emb"], pos, mask_add,
      params["lnf_w"], params["lnf_b"], w_head,
      params["ln1_w"], params["ln1_b"],
      params["wqkv"], params["bqkv"], params["wo"], params["bo"],
      params["ln2_w"], params["ln2_b"],
      params["w1"], params["b1"], params["w2"], params["b2"])

    return logits_pad[:, :V].reshape(B, T, V)


# ------------------------------ parameters ----------------------------------

def init_params(cfg, seed=0):
    E = cfg["emb_dim"]
    V = cfg["vocab_size"]
    L = cfg["n_layers"]
    C = cfg["context_len"]
    bf = jnp.bfloat16
    key = jax.random.PRNGKey(seed)
    keys = iter(jax.random.split(key, 64))

    def nrm(shape, dtype=jnp.float32, scale=0.02):
        return (scale * jax.random.normal(next(keys), shape)).astype(dtype)

    def bias(shape):
        if cfg["qkv_bias"]:
            return nrm(shape)
        return jnp.zeros(shape, jnp.float32)

    # Per-layer weights stacked along a leading n_layers axis so the whole
    # network runs as one grid=(n_layers,) pallas_call.  q/k/v are fused into
    # a single (E, 3E) projection.  Matmul weights in bf16, the rest in f32.
    wqkv = jnp.concatenate([nrm((L, E, E)), nrm((L, E, E)), nrm((L, E, E))],
                           axis=2).astype(bf)
    bqkv = jnp.concatenate([bias((L, 1, E)), bias((L, 1, E)), bias((L, 1, E))],
                           axis=2)
    params = dict(
        tok_emb=nrm((V, E), bf),
        pos_emb=nrm((C, E)),
        lnf_w=jnp.ones((1, E), jnp.float32),
        lnf_b=jnp.zeros((1, E), jnp.float32),
        w_head=nrm((E, V), bf),
        ln1_w=jnp.ones((L, 1, E), jnp.float32),
        ln1_b=jnp.zeros((L, 1, E), jnp.float32),
        ln2_w=jnp.ones((L, 1, E), jnp.float32),
        ln2_b=jnp.zeros((L, 1, E), jnp.float32),
        wqkv=wqkv, bqkv=bqkv,
        wo=nrm((L, E, E), bf), bo=nrm((L, 1, E)),
        w1=nrm((L, E, 4 * E), bf), b1=nrm((L, 1, 4 * E)),
        w2=nrm((L, 4 * E, E), bf), b2=nrm((L, 1, E)),
    )
    return params


if __name__ == "__main__":
    params = init_params(CFG, seed=0)
    B, T = 2, 8
    idx = jax.random.randint(
        jax.random.PRNGKey(0), (B, T), 0, CFG["vocab_size"], dtype=jnp.int32)
    forward = jax.jit(gpt_forward)
    logits = forward(params, idx)
    jax.block_until_ready(logits)
    assert logits.shape == (B, T, CFG["vocab_size"])
    assert bool(jnp.all(jnp.isfinite(logits)))
    print("KERNEL_OK")
</pallas_src>

<mosaic_0001>
module attributes {stable_mosaic.version = 11 : i64} {
  func.func @kernel(%arg0: i32, %arg1: memref<16x1xi32, #tpu.memory_space<vmem>>, %arg2: memref<64x32xbf16, #tpu.memory_space<vmem>>, %arg3: memref<8x32xf32, #tpu.memory_space<vmem>>, %arg4: memref<8x8xf32, #tpu.memory_space<vmem>>, %arg5: memref<1x32xf32, #tpu.memory_space<vmem>>, %arg6: memref<1x32xf32, #tpu.memory_space<vmem>>, %arg7: memref<32x128xbf16, #tpu.memory_space<vmem>>, %arg8: memref<1x1x32xf32, #tpu.memory_space<vmem>>, %arg9: memref<1x1x32xf32, #tpu.memory_space<vmem>>, %arg10: memref<1x32x96xbf16, #tpu.memory_space<vmem>>, %arg11: memref<1x1x96xf32, #tpu.memory_space<vmem>>, %arg12: memref<1x32x32xbf16, #tpu.memory_space<vmem>>, %arg13: memref<1x1x32xf32, #tpu.memory_space<vmem>>, %arg14: memref<1x1x32xf32, #tpu.memory_space<vmem>>, %arg15: memref<1x1x32xf32, #tpu.memory_space<vmem>>, %arg16: memref<1x32x128xbf16, #tpu.memory_space<vmem>>, %arg17: memref<1x1x128xf32, #tpu.memory_space<vmem>>, %arg18: memref<1x128x32xbf16, #tpu.memory_space<vmem>>, %arg19: memref<1x1x32xf32, #tpu.memory_space<vmem>>, %arg20: memref<16x128xf32, #tpu.memory_space<vmem>>, %arg21: memref<16x32xf32, #tpu.memory_space<vmem>>, %arg22: memref<16x32xf32, #tpu.memory_space<vmem>>) attributes {dimension_semantics = [#tpu.dimension_semantics<arbitrary>], iteration_bounds = array<i64: 2>, scalar_prefetch = 0 : i64, scratch_operands = 2 : i64, tpu.core_type = #tpu.core_type<tc>, window_params = [{pipeline_mode = #tpu.pipeline_mode<synchronous>, transform_indices = @transform_0, window_bounds = array<i64: 16, 1>}, {pipeline_mode = #tpu.pipeline_mode<synchronous>, transform_indices = @transform_1, window_bounds = array<i64: 64, 32>}, {pipeline_mode = #tpu.pipeline_mode<synchronous>, transform_indices = @transform_2, window_bounds = array<i64: 8, 32>}, {pipeline_mode = #tpu.pipeline_mode<synchronous>, transform_indices = @transform_3, window_bounds = array<i64: 8, 8>}, {pipeline_mode = #tpu.pipeline_mode<synchronous>, transform_indices = @transform_4, window_bounds = array<i64: 1, 32>}, {pipeline_mode = #tpu.pipeline_mode<synchronous>, transform_indices = @transform_5, window_bounds = array<i64: 1, 32>}, {pipeline_mode = #tpu.pipeline_mode<synchronous>, transform_indices = @transform_6, window_bounds = array<i64: 32, 128>}, {transform_indices = @transform_7, window_bounds = array<i64: 1, 1, 32>}, {transform_indices = @transform_8, window_bounds = array<i64: 1, 1, 32>}, {transform_indices = @transform_9, window_bounds = array<i64: 1, 32, 96>}, {transform_indices = @transform_10, window_bounds = array<i64: 1, 1, 96>}, {transform_indices = @transform_11, window_bounds = array<i64: 1, 32, 32>}, {transform_indices = @transform_12, window_bounds = array<i64: 1, 1, 32>}, {transform_indices = @transform_13, window_bounds = array<i64: 1, 1, 32>}, {transform_indices = @transform_14, window_bounds = array<i64: 1, 1, 32>}, {transform_indices = @transform_15, window_bounds = array<i64: 1, 32, 128>}, {transform_indices = @transform_16, window_bounds = array<i64: 1, 1, 128>}, {transform_indices = @transform_17, window_bounds = array<i64: 1, 128, 32>}, {transform_indices = @transform_18, window_bounds = array<i64: 1, 1, 32>}, {pipeline_mode = #tpu.pipeline_mode<synchronous>, transform_indices = @transform_19, window_bounds = array<i64: 16, 128>}]} {
    %c0_i32 = arith.constant 0 : i32
    %0 = arith.cmpi eq, %arg0, %c0_i32 : i32
    %1 = arith.extui %0 : i1 to i32
    %c0_i32_0 = arith.constant 0 : i32
    %2 = arith.cmpi ne, %1, %c0_i32_0 : i32
    scf.if %2 {
      %c0_86 = arith.constant 0 : index
      %c0_87 = arith.constant 0 : index
      %212 = vector.load %arg1[%c0_86, %c0_87] : memref<16x1xi32, #tpu.memory_space<vmem>>, vector<16x1xi32>
      %213 = tpu.iota {dimensions = array<i32: 1>} : vector<16x64xi32>
      %214 = vector.broadcast %212 : vector<16x1xi32> to vector<16x64xi32>
      %215 = arith.cmpi eq, %213, %214 : vector<16x64xi32>
      %216 = arith.extui %215 : vector<16x64xi1> to vector<16x64xi32>
      %217 = arith.sitofp %216 : vector<16x64xi32> to vector<16x64xf32>
      %218 = arith.truncf %217 : vector<16x64xf32> to vector<16x64xbf16>
      %c0_88 = arith.constant 0 : index
      %c0_89 = arith.constant 0 : index
      %219 = vector.load %arg2[%c0_88, %c0_89] : memref<64x32xbf16, #tpu.memory_space<vmem>>, vector<64x32xbf16>
      %cst_90 = arith.constant dense<0.000000e+00> : vector<16x32xf32>
      %220 = tpu.matmul %218, %219, %cst_90 {dimension_numbers = #tpu.dot_dimension_numbers<[1], [0], [0], [1], [0, 0, 1, 1], [], []>} : vector<16x64xbf16>, vector<64x32xbf16>, vector<16x32xf32> -> vector<16x32xf32>
      %c0_91 = arith.constant 0 : index
      %c0_92 = arith.constant 0 : index
      %221 = vector.load %arg3[%c0_91, %c0_92] : memref<8x32xf32, #tpu.memory_space<vmem>>, vector<8x32xf32>
      %222 = vector.shape_cast %221 : vector<8x32xf32> to vector<1x8x32xf32>
      %223 = vector.shape_cast %222 : vector<1x8x32xf32> to vector<1x8x32xf32>
      %224 = vector.broadcast %223 : vector<1x8x32xf32> to vector<2x8x32xf32>
      %225 = vector.shape_cast %224 : vector<2x8x32xf32> to vector<16x32xf32>
      %226 = arith.addf %220, %225 : vector<16x32xf32>
      %c0_93 = arith.constant 0 : index
      %c0_94 = arith.constant 0 : index
      %227 = vector.load %arg21[%c0_93, %c0_94] : memref<16x32xf32, #tpu.memory_space<vmem>>, vector<16x32xf32>
      tpu.vector_store %arg21[%c0_93, %c0_94], %226 {strides = array<i32>} : memref<16x32xf32, #tpu.memory_space<vmem>>, vector<16x32xf32>,
    } else {
    }
    %c0 = arith.constant 0 : index
    %c0_1 = arith.constant 0 : index
    %3 = vector.load %arg21[%c0, %c0_1] : memref<16x32xf32, #tpu.memory_space<vmem>>, vector<16x32xf32>
    %c0_2 = arith.constant 0 : index
    %c0_3 = arith.constant 0 : index
    %c0_4 = arith.constant 0 : index
    %4 = vector.load %arg8[%c0_2, %c0_3, %c0_4] : memref<1x1x32xf32, #tpu.memory_space<vmem>>, vector<1x1x32xf32>
    %5 = vector.shape_cast %4 : vector<1x1x32xf32> to vector<1x32xf32>
    %c0_5 = arith.constant 0 : index
    %c0_6 = arith.constant 0 : index
    %c0_7 = arith.constant 0 : index
    %6 = vector.load %arg9[%c0_5, %c0_6, %c0_7] : memref<1x1x32xf32, #tpu.memory_space<vmem>>, vector<1x1x32xf32>
    %7 = vector.shape_cast %6 : vector<1x1x32xf32> to vector<1x32xf32>
    %cst = arith.constant dense<0.000000e+00> : vector<16xf32>
    %8 = vector.multi_reduction <add>, %3, %cst [1] : vector<16x32xf32> to vector<16xf32>
    %9 = vector.shape_cast %8 : vector<16xf32> to vector<16x1xf32>
    %cst_8 = arith.constant 3.200000e+01 : f32
    %10 = vector.broadcast %cst_8 : f32 to vector<16x1xf32>
    %11 = arith.divf %9, %10 : vector<16x1xf32>
    %12 = vector.broadcast %11 : vector<16x1xf32> to vector<16x32xf32>
    %13 = arith.subf %3, %12 : vector<16x32xf32>
    %14 = arith.mulf %13, %13 : vector<16x32xf32>
    %cst_9 = arith.constant dense<0.000000e+00> : vector<16xf32>
    %15 = vector.multi_reduction <add>, %14, %cst_9 [1] : vector<16x32xf32> to vector<16xf32>
    %16 = vector.shape_cast %15 : vector<16xf32> to vector<16x1xf32>
    %cst_10 = arith.constant 0.0322580636 : f32
    %17 = vector.broadcast %cst_10 : f32 to vector<16x1xf32>
    %18 = arith.mulf %16, %17 : vector<16x1xf32>
    %19 = math.sqrt %18 : vector<16x1xf32>
    %cst_11 = arith.constant 9.99999974E-6 : f32
    %20 = vector.broadcast %cst_11 : f32 to vector<16x1xf32>
    %21 = arith.addf %19, %20 : vector<16x1xf32>
    %22 = tpu.reciprocal %21 {approx = true} : vector<16x1xf32> -> vector<16x1xf32>
    %23 = vector.broadcast %22 : vector<16x1xf32> to vector<16x32xf32>
    %24 = arith.mulf %13, %23 : vector<16x32xf32>
    %25 = vector.broadcast %5 : vector<1x32xf32> to vector<16x32xf32>
    %26 = arith.mulf %24, %25 : vector<16x32xf32>
    %27 = vector.broadcast %7 : vector<1x32xf32> to vector<16x32xf32>
    %28 = arith.addf %26, %27 : vector<16x32xf32>
    %29 = arith.truncf %28 : vector<16x32xf32> to vector<16x32xbf16>
    %c0_12 = arith.constant 0 : index
    %c0_13 = arith.constant 0 : index
    %c0_14 = arith.constant 0 : index
    %30 = vector.load %arg10[%c0_12, %c0_13, %c0_14] : memref<1x32x96xbf16, #tpu.memory_space<vmem>>, vector<1x32x96xbf16>
    %31 = vector.shape_cast %30 : vector<1x32x96xbf16> to vector<32x96xbf16>
    %cst_15 = arith.constant dense<0.000000e+00> : vector<16x96xf32>
    %32 = tpu.matmul %29, %31, %cst_15 {dimension_numbers = #tpu.dot_dimension_numbers<[1], [0], [0], [1], [0, 0, 1, 1], [], []>} : vector<16x32xbf16>, vector<32x96xbf16>, vector<16x96xf32> -> vector<16x96xf32>
    %c0_16 = arith.constant 0 : index
    %c0_17 = arith.constant 0 : index
    %c0_18 = arith.constant 0 : index
    %33 = vector.load %arg11[%c0_16, %c0_17, %c0_18] : memref<1x1x96xf32, #tpu.memory_space<vmem>>, vector<1x1x96xf32>
    %34 = vector.shape_cast %33 : vector<1x1x96xf32> to vector<1x96xf32>
    %35 = vector.broadcast %34 : vector<1x96xf32> to vector<16x96xf32>
    %36 = arith.addf %32, %35 : vector<16x96xf32>
    %37 = vector.extract_strided_slice %36 {offsets = [0, 0], sizes = [16, 32], strides = [1, 1]} : vector<16x96xf32> to vector<16x32xf32>
    %38 = vector.shape_cast %37 : vector<16x32xf32> to vector<2x8x32xf32>
    %39 = vector.extract_strided_slice %36 {offsets = [0, 32], sizes = [16, 32], strides = [1, 1]} : vector<16x96xf32> to vector<16x32xf32>
    %40 = vector.shape_cast %39 : vector<16x32xf32> to vector<2x8x32xf32>
    %41 = vector.extract_strided_slice %36 {offsets = [0, 64], sizes = [16, 32], strides = [1, 1]} : vector<16x96xf32> to vector<16x32xf32>
    %42 = vector.shape_cast %41 : vector<16x32xf32> to vector<2x8x32xf32>
    %c0_19 = arith.constant 0 : index
    %c0_20 = arith.constant 0 : index
    %43 = vector.load %arg4[%c0_19, %c0_20] : memref<8x8xf32, #tpu.memory_space<vmem>>, vector<8x8xf32>
    %44 = vector.extract_strided_slice %38 {offsets = [0, 0, 0], sizes = [2, 8, 8], strides = [1, 1, 1]} : vector<2x8x32xf32> to vector<2x8x8xf32>
    %45 = arith.truncf %44 : vector<2x8x8xf32> to vector<2x8x8xbf16>
    %46 = vector.extract_strided_slice %40 {offsets = [0, 0, 0], sizes = [2, 8, 8], strides = [1, 1, 1]} : vector<2x8x32xf32> to vector<2x8x8xf32>
    %47 = arith.truncf %46 : vector<2x8x8xf32> to vector<2x8x8xbf16>
    %48 = vector.extract_strided_slice %42 {offsets = [0, 0, 0], sizes = [2, 8, 8], strides = [1, 1, 1]} : vector<2x8x32xf32> to vector<2x8x8xf32>
    %49 = arith.truncf %48 : vector<2x8x8xf32> to vector<2x8x8xbf16>
    "tpu.trace_start"() <{level = 10 : i32, message = "bqd,bkd->bqk"}> : () -> ()
    %cst_21 = arith.constant dense<0.000000e+00> : vector<2x8x8xf32>
    %50 = tpu.matmul %45, %47, %cst_21 {dimension_numbers = #tpu.dot_dimension_numbers<[2], [2], [1], [1], [0, 0, 0, 1, 1, 1], [0], [0]>} : vector<2x8x8xbf16>, vector<2x8x8xbf16>, vector<2x8x8xf32> -> vector<2x8x8xf32>
    "tpu.trace_stop"() : () -> ()
    %cst_22 = arith.constant 0.353553385 : f32
    %51 = vector.broadcast %cst_22 : f32 to vector<2x8x8xf32>
    %52 = arith.mulf %50, %51 : vector<2x8x8xf32>
    %53 = vector.shape_cast %43 : vector<8x8xf32> to vector<1x8x8xf32>
    %54 = vector.broadcast %53 : vector<1x8x8xf32> to vector<2x8x8xf32>
    %55 = arith.addf %52, %54 : vector<2x8x8xf32>
    %cst_23 = arith.constant dense<0xFF800000> : vector<2x8xf32>
    %56 = vector.multi_reduction <maximumf>, %55, %cst_23 [2] : vector<2x8x8xf32> to vector<2x8xf32>
    %57 = vector.shape_cast %56 : vector<2x8xf32> to vector<2x8x1xf32>
    %58 = vector.broadcast %57 : vector<2x8x1xf32> to vector<2x8x8xf32>
    %59 = arith.subf %55, %58 : vector<2x8x8xf32>
    %60 = math.exp %59 : vector<2x8x8xf32>
    %cst_24 = arith.constant dense<0.000000e+00> : vector<2x8xf32>
    %61 = vector.multi_reduction <add>, %60, %cst_24 [2] : vector<2x8x8xf32> to vector<2x8xf32>
    %62 = vector.shape_cast %61 : vector<2x8xf32> to vector<2x8x1xf32>
    %63 = tpu.reciprocal %62 {approx = true} : vector<2x8x1xf32> -> vector<2x8x1xf32>
    %64 = vector.broadcast %63 : vector<2x8x1xf32> to vector<2x8x8xf32>
    %65 = arith.mulf %60, %64 : vector<2x8x8xf32>
    %66 = arith.truncf %65 : vector<2x8x8xf32> to vector<2x8x8xbf16>
    "tpu.trace_start"() <{level = 10 : i32, message = "bqk,bkd->bqd"}> : () -> ()
    %cst_25 = arith.constant dense<0.000000e+00> : vector<2x8x8xf32>
    %67 = tpu.matmul %66, %49, %cst_25 {dimension_numbers = #tpu.dot_dimension_numbers<[2], [1], [1], [2], [0, 0, 0, 1, 1, 2], [0], [0]>} : vector<2x8x8xbf16>, vector<2x8x8xbf16>, vector<2x8x8xf32> -> vector<2x8x8xf32>
    "tpu.trace_stop"() : () -> ()
    %68 = vector.shape_cast %67 : vector<2x8x8xf32> to vector<16x8xf32>
    %c0_26 = arith.constant 0 : index
    %c0_27 = arith.constant 0 : index
    %69 = vector.load %arg22[%c0_26, %c0_27] : memref<16x32xf32, #tpu.memory_space<vmem>>, vector<16x8xf32>
    tpu.vector_store %arg22[%c0_26, %c0_27], %68 {strides = array<i32>} : memref<16x32xf32, #tpu.memory_space<vmem>>, vector<16x8xf32>,
    %70 = vector.extract_strided_slice %38 {offsets = [0, 0, 8], sizes = [2, 8, 8], strides = [1, 1, 1]} : vector<2x8x32xf32> to vector<2x8x8xf32>
    %71 = arith.truncf %70 : vector<2x8x8xf32> to vector<2x8x8xbf16>
    %72 = vector.extract_strided_slice %40 {offsets = [0, 0, 8], sizes = [2, 8, 8], strides = [1, 1, 1]} : vector<2x8x32xf32> to vector<2x8x8xf32>
    %73 = arith.truncf %72 : vector<2x8x8xf32> to vector<2x8x8xbf16>
    %74 = vector.extract_strided_slice %42 {offsets = [0, 0, 8], sizes = [2, 8, 8], strides = [1, 1, 1]} : vector<2x8x32xf32> to vector<2x8x8xf32>
    %75 = arith.truncf %74 : vector<2x8x8xf32> to vector<2x8x8xbf16>
    "tpu.trace_start"() <{level = 10 : i32, message = "bqd,bkd->bqk"}> : () -> ()
    %cst_28 = arith.constant dense<0.000000e+00> : vector<2x8x8xf32>
    %76 = tpu.matmul %71, %73, %cst_28 {dimension_numbers = #tpu.dot_dimension_numbers<[2], [2], [1], [1], [0, 0, 0, 1, 1, 1], [0], [0]>} : vector<2x8x8xbf16>, vector<2x8x8xbf16>, vector<2x8x8xf32> -> vector<2x8x8xf32>
    "tpu.trace_stop"() : () -> ()
    %cst_29 = arith.constant 0.353553385 : f32
    %77 = vector.broadcast %cst_29 : f32 to vector<2x8x8xf32>
    %78 = arith.mulf %76, %77 : vector<2x8x8xf32>
    %79 = vector.shape_cast %43 : vector<8x8xf32> to vector<1x8x8xf32>
    %80 = vector.broadcast %79 : vector<1x8x8xf32> to vector<2x8x8xf32>
    %81 = arith.addf %78, %80 : vector<2x8x8xf32>
    %cst_30 = arith.constant dense<0xFF800000> : vector<2x8xf32>
    %82 = vector.multi_reduction <maximumf>, %81, %cst_30 [2] : vector<2x8x8xf32> to vector<2x8xf32>
    %83 = vector.shape_cast %82 : vector<2x8xf32> to vector<2x8x1xf32>
    %84 = vector.broadcast %83 : vector<2x8x1xf32> to vector<2x8x8xf32>
    %85 = arith.subf %81, %84 : vector<2x8x8xf32>
    %86 = math.exp %85 : vector<2x8x8xf32>
    %cst_31 = arith.constant dense<0.000000e+00> : vector<2x8xf32>
    %87 = vector.multi_reduction <add>, %86, %cst_31 [2] : vector<2x8x8xf32> to vector<2x8xf32>
    %88 = vector.shape_cast %87 : vector<2x8xf32> to vector<2x8x1xf32>
    %89 = tpu.reciprocal %88 {approx = true} : vector<2x8x1xf32> -> vector<2x8x1xf32>
    %90 = vector.broadcast %89 : vector<2x8x1xf32> to vector<2x8x8xf32>
    %91 = arith.mulf %86, %90 : vector<2x8x8xf32>
    %92 = arith.truncf %91 : vector<2x8x8xf32> to vector<2x8x8xbf16>
    "tpu.trace_start"() <{level = 10 : i32, message = "bqk,bkd->bqd"}> : () -> ()
    %cst_32 = arith.constant dense<0.000000e+00> : vector<2x8x8xf32>
    %93 = tpu.matmul %92, %75, %cst_32 {dimension_numbers = #tpu.dot_dimension_numbers<[2], [1], [1], [2], [0, 0, 0, 1, 1, 2], [0], [0]>} : vector<2x8x8xbf16>, vector<2x8x8xbf16>, vector<2x8x8xf32> -> vector<2x8x8xf32>
    "tpu.trace_stop"() : () -> ()
    %94 = vector.shape_cast %93 : vector<2x8x8xf32> to vector<16x8xf32>
    %c0_33 = arith.constant 0 : index
    %c8 = arith.constant 8 : index
    %95 = vector.load %arg22[%c0_33, %c8] : memref<16x32xf32, #tpu.memory_space<vmem>>, vector<16x8xf32>
    tpu.vector_store %arg22[%c0_33, %c8], %94 {strides = array<i32>} : memref<16x32xf32, #tpu.memory_space<vmem>>, vector<16x8xf32>,
    %96 = vector.extract_strided_slice %38 {offsets = [0, 0, 16], sizes = [2, 8, 8], strides = [1, 1, 1]} : vector<2x8x32xf32> to vector<2x8x8xf32>
    %97 = arith.truncf %96 : vector<2x8x8xf32> to vector<2x8x8xbf16>
    %98 = vector.extract_strided_slice %40 {offsets = [0, 0, 16], sizes = [2, 8, 8], strides = [1, 1, 1]} : vector<2x8x32xf32> to vector<2x8x8xf32>
    %99 = arith.truncf %98 : vector<2x8x8xf32> to vector<2x8x8xbf16>
    %100 = vector.extract_strided_slice %42 {offsets = [0, 0, 16], sizes = [2, 8, 8], strides = [1, 1, 1]} : vector<2x8x32xf32> to vector<2x8x8xf32>
    %101 = arith.truncf %100 : vector<2x8x8xf32> to vector<2x8x8xbf16>
    "tpu.trace_start"() <{level = 10 : i32, message = "bqd,bkd->bqk"}> : () -> ()
    %cst_34 = arith.constant dense<0.000000e+00> : vector<2x8x8xf32>
    %102 = tpu.matmul %97, %99, %cst_34 {dimension_numbers = #tpu.dot_dimension_numbers<[2], [2], [1], [1], [0, 0, 0, 1, 1, 1], [0], [0]>} : vector<2x8x8xbf16>, vector<2x8x8xbf16>, vector<2x8x8xf32> -> vector<2x8x8xf32>
    "tpu.trace_stop"() : () -> ()
    %cst_35 = arith.constant 0.353553385 : f32
    %103 = vector.broadcast %cst_35 : f32 to vector<2x8x8xf32>
    %104 = arith.mulf %102, %103 : vector<2x8x8xf32>
    %105 = vector.shape_cast %43 : vector<8x8xf32> to vector<1x8x8xf32>
    %106 = vector.broadcast %105 : vector<1x8x8xf32> to vector<2x8x8xf32>
    %107 = arith.addf %104, %106 : vector<2x8x8xf32>
    %cst_36 = arith.constant dense<0xFF800000> : vector<2x8xf32>
    %108 = vector.multi_reduction <maximumf>, %107, %cst_36 [2] : vector<2x8x8xf32> to vector<2x8xf32>
    %109 = vector.shape_cast %108 : vector<2x8xf32> to vector<2x8x1xf32>
    %110 = vector.broadcast %109 : vector<2x8x1xf32> to vector<2x8x8xf32>
    %111 = arith.subf %107, %110 : vector<2x8x8xf32>
    %112 = math.exp %111 : vector<2x8x8xf32>
    %cst_37 = arith.constant dense<0.000000e+00> : vector<2x8xf32>
    %113 = vector.multi_reduction <add>, %112, %cst_37 [2] : vector<2x8x8xf32> to vector<2x8xf32>
    %114 = vector.shape_cast %113 : vector<2x8xf32> to vector<2x8x1xf32>
    %115 = tpu.reciprocal %114 {approx = true} : vector<2x8x1xf32> -> vector<2x8x1xf32>
    %116 = vector.broadcast %115 : vector<2x8x1xf32> to vector<2x8x8xf32>
    %117 = arith.mulf %112, %116 : vector<2x8x8xf32>
    %118 = arith.truncf %117 : vector<2x8x8xf32> to vector<2x8x8xbf16>
    "tpu.trace_start"() <{level = 10 : i32, message = "bqk,bkd->bqd"}> : () -> ()
    %cst_38 = arith.constant dense<0.000000e+00> : vector<2x8x8xf32>
    %119 = tpu.matmul %118, %101, %cst_38 {dimension_numbers = #tpu.dot_dimension_numbers<[2], [1], [1], [2], [0, 0, 0, 1, 1, 2], [0], [0]>} : vector<2x8x8xbf16>, vector<2x8x8xbf16>, vector<2x8x8xf32> -> vector<2x8x8xf32>
    "tpu.trace_stop"() : () -> ()
    %120 = vector.shape_cast %119 : vector<2x8x8xf32> to vector<16x8xf32>
    %c0_39 = arith.constant 0 : index
    %c16 = arith.constant 16 : index
    %121 = vector.load %arg22[%c0_39, %c16] : memref<16x32xf32, #tpu.memory_space<vmem>>, vector<16x8xf32>
    tpu.vector_store %arg22[%c0_39, %c16], %120 {strides = array<i32>} : memref<16x32xf32, #tpu.memory_space<vmem>>, vector<16x8xf32>,
    %122 = vector.extract_strided_slice %38 {offsets = [0, 0, 24], sizes = [2, 8, 8], strides = [1, 1, 1]} : vector<2x8x32xf32> to vector<2x8x8xf32>
    %123 = arith.truncf %122 : vector<2x8x8xf32> to vector<2x8x8xbf16>
    %124 = vector.extract_strided_slice %40 {offsets = [0, 0, 24], sizes = [2, 8, 8], strides = [1, 1, 1]} : vector<2x8x32xf32> to vector<2x8x8xf32>
    %125 = arith.truncf %124 : vector<2x8x8xf32> to vector<2x8x8xbf16>
    %126 = vector.extract_strided_slice %42 {offsets = [0, 0, 24], sizes = [2, 8, 8], strides = [1, 1, 1]} : vector<2x8x32xf32> to vector<2x8x8xf32>
    %127 = arith.truncf %126 : vector<2x8x8xf32> to vector<2x8x8xbf16>
    "tpu.trace_start"() <{level = 10 : i32, message = "bqd,bkd->bqk"}> : () -> ()
    %cst_40 = arith.constant dense<0.000000e+00> : vector<2x8x8xf32>
    %128 = tpu.matmul %123, %125, %cst_40 {dimension_numbers = #tpu.dot_dimension_numbers<[2], [2], [1], [1], [0, 0, 0, 1, 1, 1], [0], [0]>} : vector<2x8x8xbf16>, vector<2x8x8xbf16>, vector<2x8x8xf32> -> vector<2x8x8xf32>
    "tpu.trace_stop"() : () -> ()
    %cst_41 = arith.constant 0.353553385 : f32
    %129 = vector.broadcast %cst_41 : f32 to vector<2x8x8xf32>
    %130 = arith.mulf %128, %129 : vector<2x8x8xf32>
    %131 = vector.shape_cast %43 : vector<8x8xf32> to vector<1x8x8xf32>
    %132 = vector.broadcast %131 : vector<1x8x8xf32> to vector<2x8x8xf32>
    %133 = arith.addf %130, %132 : vector<2x8x8xf32>
    %cst_42 = arith.constant dense<0xFF800000> : vector<2x8xf32>
    %134 = vector.multi_reduction <maximumf>, %133, %cst_42 [2] : vector<2x8x8xf32> to vector<2x8xf32>
    %135 = vector.shape_cast %134 : vector<2x8xf32> to vector<2x8x1xf32>
    %136 = vector.broadcast %135 : vector<2x8x1xf32> to vector<2x8x8xf32>
    %137 = arith.subf %133, %136 : vector<2x8x8xf32>
    %138 = math.exp %137 : vector<2x8x8xf32>
    %cst_43 = arith.constant dense<0.000000e+00> : vector<2x8xf32>
    %139 = vector.multi_reduction <add>, %138, %cst_43 [2] : vector<2x8x8xf32> to vector<2x8xf32>
    %140 = vector.shape_cast %139 : vector<2x8xf32> to vector<2x8x1xf32>
    %141 = tpu.reciprocal %140 {approx = true} : vector<2x8x1xf32> -> vector<2x8x1xf32>
    %142 = vector.broadcast %141 : vector<2x8x1xf32> to vector<2x8x8xf32>
    %143 = arith.mulf %138, %142 : vector<2x8x8xf32>
    %144 = arith.truncf %143 : vector<2x8x8xf32> to vector<2x8x8xbf16>
    "tpu.trace_start"() <{level = 10 : i32, message = "bqk,bkd->bqd"}> : () -> ()
    %cst_44 = arith.constant dense<0.000000e+00> : vector<2x8x8xf32>
    %145 = tpu.matmul %144, %127, %cst_44 {dimension_numbers = #tpu.dot_dimension_numbers<[2], [1], [1], [2], [0, 0, 0, 1, 1, 2], [0], [0]>} : vector<2x8x8xbf16>, vector<2x8x8xbf16>, vector<2x8x8xf32> -> vector<2x8x8xf32>
    "tpu.trace_stop"() : () -> ()
    %146 = vector.shape_cast %145 : vector<2x8x8xf32> to vector<16x8xf32>
    %c0_45 = arith.constant 0 : index
    %c24 = arith.constant 24 : index
    %147 = vector.load %arg22[%c0_45, %c24] : memref<16x32xf32, #tpu.memory_space<vmem>>, vector<16x8xf32>
    tpu.vector_store %arg22[%c0_45, %c24], %146 {strides = array<i32>} : memref<16x32xf32, #tpu.memory_space<vmem>>, vector<16x8xf32>,
    %c0_46 = arith.constant 0 : index
    %c0_47 = arith.constant 0 : index
    %148 = vector.load %arg22[%c0_46, %c0_47] : memref<16x32xf32, #tpu.memory_space<vmem>>, vector<16x32xf32>
    %149 = arith.truncf %148 : vector<16x32xf32> to vector<16x32xbf16>
    %c0_48 = arith.constant 0 : index
    %c0_49 = arith.constant 0 : index
    %c0_50 = arith.constant 0 : index
    %150 = vector.load %arg12[%c0_48, %c0_49, %c0_50] : memref<1x32x32xbf16, #tpu.memory_space<vmem>>, vector<1x32x32xbf16>
    %151 = vector.shape_cast %150 : vector<1x32x32xbf16> to vector<32x32xbf16>
    %cst_51 = arith.constant dense<0.000000e+00> : vector<16x32xf32>
    %152 = tpu.matmul %149, %151, %cst_51 {dimension_numbers = #tpu.dot_dimension_numbers<[1], [0], [0], [1], [0, 0, 1, 1], [], []>} : vector<16x32xbf16>, vector<32x32xbf16>, vector<16x32xf32> -> vector<16x32xf32>
    %c0_52 = arith.constant 0 : index
    %c0_53 = arith.constant 0 : index
    %c0_54 = arith.constant 0 : index
    %153 = vector.load %arg13[%c0_52, %c0_53, %c0_54] : memref<1x1x32xf32, #tpu.memory_space<vmem>>, vector<1x1x32xf32>
    %154 = vector.shape_cast %153 : vector<1x1x32xf32> to vector<1x32xf32>
    %155 = vector.broadcast %154 : vector<1x32xf32> to vector<16x32xf32>
    %156 = arith.addf %152, %155 : vector<16x32xf32>
    %157 = arith.addf %3, %156 : vector<16x32xf32>
    %c0_55 = arith.constant 0 : index
    %c0_56 = arith.constant 0 : index
    %c0_57 = arith.constant 0 : index
    %158 = vector.load %arg14[%c0_55, %c0_56, %c0_57] : memref<1x1x32xf32, #tpu.memory_space<vmem>>, vector<1x1x32xf32>
    %159 = vector.shape_cast %158 : vector<1x1x32xf32> to vector<1x32xf32>
    %c0_58 = arith.constant 0 : index
    %c0_59 = arith.constant 0 : index
    %c0_60 = arith.constant 0 : index
    %160 = vector.load %arg15[%c0_58, %c0_59, %c0_60] : memref<1x1x32xf32, #tpu.memory_space<vmem>>, vector<1x1x32xf32>
    %161 = vector.shape_cast %160 : vector<1x1x32xf32> to vector<1x32xf32>
    %cst_61 = arith.constant dense<0.000000e+00> : vector<16xf32>
    %162 = vector.multi_reduction <add>, %157, %cst_61 [1] : vector<16x32xf32> to vector<16xf32>
    %163 = vector.shape_cast %162 : vector<16xf32> to vector<16x1xf32>
    %cst_62 = arith.constant 3.200000e+01 : f32
    %164 = vector.broadcast %cst_62 : f32 to vector<16x1xf32>
    %165 = arith.divf %163, %164 : vector<16x1xf32>
    %166 = vector.broadcast %165 : vector<16x1xf32> to vector<16x32xf32>
    %167 = arith.subf %157, %166 : vector<16x32xf32>
    %168 = arith.mulf %167, %167 : vector<16x32xf32>
    %cst_63 = arith.constant dense<0.000000e+00> : vector<16xf32>
    %169 = vector.multi_reduction <add>, %168, %cst_63 [1] : vector<16x32xf32> to vector<16xf32>
    %170 = vector.shape_cast %169 : vector<16xf32> to vector<16x1xf32>
    %cst_64 = arith.constant 0.0322580636 : f32
    %171 = vector.broadcast %cst_64 : f32 to vector<16x1xf32>
    %172 = arith.mulf %170, %171 : vector<16x1xf32>
    %173 = math.sqrt %172 : vector<16x1xf32>
    %cst_65 = arith.constant 9.99999974E-6 : f32
    %174 = vector.broadcast %cst_65 : f32 to vector<16x1xf32>
    %175 = arith.addf %173, %174 : vector<16x1xf32>
    %176 = tpu.reciprocal %175 {approx = true} : vector<16x1xf32> -> vector<16x1xf32>
    %177 = vector.broadcast %176 : vector<16x1xf32> to vector<16x32xf32>
    %178 = arith.mulf %167, %177 : vector<16x32xf32>
    %179 = vector.broadcast %159 : vector<1x32xf32> to vector<16x32xf32>
    %180 = arith.mulf %178, %179 : vector<16x32xf32>
    %181 = vector.broadcast %161 : vector<1x32xf32> to vector<16x32xf32>
    %182 = arith.addf %180, %181 : vector<16x32xf32>
    %183 = arith.truncf %182 : vector<16x32xf32> to vector<16x32xbf16>
    %c0_66 = arith.constant 0 : index
    %c0_67 = arith.constant 0 : index
    %c0_68 = arith.constant 0 : index
    %184 = vector.load %arg16[%c0_66, %c0_67, %c0_68] : memref<1x32x128xbf16, #tpu.memory_space<vmem>>, vector<1x32x128xbf16>
    %185 = vector.shape_cast %184 : vector<1x32x128xbf16> to vector<32x128xbf16>
    %cst_69 = arith.constant dense<0.000000e+00> : vector<16x128xf32>
    %186 = tpu.matmul %183, %185, %cst_69 {dimension_numbers = #tpu.dot_dimension_numbers<[1], [0], [0], [1], [0, 0, 1, 1], [], []>} : vector<16x32xbf16>, vector<32x128xbf16>, vector<16x128xf32> -> vector<16x128xf32>
    %c0_70 = arith.constant 0 : index
    %c0_71 = arith.constant 0 : index
    %c0_72 = arith.constant 0 : index
    %187 = vector.load %arg17[%c0_70, %c0_71, %c0_72] : memref<1x1x128xf32, #tpu.memory_space<vmem>>, vector<1x1x128xf32>
    %188 = vector.shape_cast %187 : vector<1x1x128xf32> to vector<1x128xf32>
    %189 = vector.broadcast %188 : vector<1x128xf32> to vector<16x128xf32>
    %190 = arith.addf %186, %189 : vector<16x128xf32>
    %cst_73 = arith.constant 5.000000e-01 : f32
    %191 = vector.broadcast %cst_73 : f32 to vector<16x128xf32>
    %192 = arith.mulf %191, %190 : vector<16x128xf32>
    %cst_74 = arith.constant 0.707106769 : f32
    %193 = vector.broadcast %cst_74 : f32 to vector<16x128xf32>
    %194 = arith.mulf %190, %193 : vector<16x128xf32>
    %195 = math.erf %194 : vector<16x128xf32>
    %cst_75 = arith.constant 1.000000e+00 : f32
    %196 = vector.broadcast %cst_75 : f32 to vector<16x128xf32>
    %197 = arith.addf %196, %195 : vector<16x128xf32>
    %198 = arith.mulf %192, %197 : vector<16x128xf32>
    %199 = arith.truncf %198 : vector<16x128xf32> to vector<16x128xbf16>
    %c0_76 = arith.constant 0 : index
    %c0_77 = arith.constant 0 : index
    %c0_78 = arith.constant 0 : index
    %200 = vector.load %arg18[%c0_76, %c0_77, %c0_78] : memref<1x128x32xbf16, #tpu.memory_space<vmem>>, vector<1x128x32xbf16>
    %201 = vector.shape_cast %200 : vector<1x128x32xbf16> to vector<128x32xbf16>
    %cst_79 = arith.constant dense<0.000000e+00> : vector<16x32xf32>
    %202 = tpu.matmul %199, %201, %cst_79 {dimension_numbers = #tpu.dot_dimension_numbers<[1], [0], [0], [1], [0, 0, 1, 1], [], []>} : vector<16x128xbf16>, vector<128x32xbf16>, vector<16x32xf32> -> vector<16x32xf32>
    %c0_80 = arith.constant 0 : index
    %c0_81 = arith.constant 0 : index
    %c0_82 = arith.constant 0 : index
    %203 = vector.load %arg19[%c0_80, %c0_81, %c0_82] : memref<1x1x32xf32, #tpu.memory_space<vmem>>, vector<1x1x32xf32>
    %204 = vector.shape_cast %203 : vector<1x1x32xf32> to vector<1x32xf32>
    %205 = vector.broadcast %204 : vector<1x32xf32> to vector<16x32xf32>
    %206 = arith.addf %202, %205 : vector<16x32xf32>
    %207 = arith.addf %157, %206 : vector<16x32xf32>
    %c0_83 = arith.constant 0 : index
    %c0_84 = arith.constant 0 : index
    %208 = vector.load %arg21[%c0_83, %c0_84] : memref<16x32xf32, #tpu.memory_space<vmem>>, vector<16x32xf32>
    tpu.vector_store %arg21[%c0_83, %c0_84], %207 {strides = array<i32>} : memref<16x32xf32, #tpu.memory_space<vmem>>, vector<16x32xf32>,
    %c1_i32 = arith.constant 1 : i32
    %209 = arith.cmpi eq, %arg0, %c1_i32 : i32
    %210 = arith.extui %209 : i1 to i32
    %c0_i32_85 = arith.constant 0 : i32
    %211 = arith.cmpi ne, %210, %c0_i32_85 : i32
    scf.if %211 {
      %c0_86 = arith.constant 0 : index
      %c0_87 = arith.constant 0 : index
      %212 = vector.load %arg5[%c0_86, %c0_87] : memref<1x32xf32, #tpu.memory_space<vmem>>, vector<1x32xf32>
      %c0_88 = arith.constant 0 : index
      %c0_89 = arith.constant 0 : index
      %213 = vector.load %arg6[%c0_88, %c0_89] : memref<1x32xf32, #tpu.memory_space<vmem>>, vector<1x32xf32>
      %cst_90 = arith.constant dense<0.000000e+00> : vector<16xf32>
      %214 = vector.multi_reduction <add>, %207, %cst_90 [1] : vector<16x32xf32> to vector<16xf32>
      %215 = vector.shape_cast %214 : vector<16xf32> to vector<16x1xf32>
      %cst_91 = arith.constant 3.200000e+01 : f32
      %216 = vector.broadcast %cst_91 : f32 to vector<16x1xf32>
      %217 = arith.divf %215, %216 : vector<16x1xf32>
      %218 = vector.broadcast %217 : vector<16x1xf32> to vector<16x32xf32>
      %219 = arith.subf %207, %218 : vector<16x32xf32>
      %220 = arith.mulf %219, %219 : vector<16x32xf32>
      %cst_92 = arith.constant dense<0.000000e+00> : vector<16xf32>
      %221 = vector.multi_reduction <add>, %220, %cst_92 [1] : vector<16x32xf32> to vector<16xf32>
      %222 = vector.shape_cast %221 : vector<16xf32> to vector<16x1xf32>
      %cst_93 = arith.constant 0.0322580636 : f32
      %223 = vector.broadcast %cst_93 : f32 to vector<16x1xf32>
      %224 = arith.mulf %222, %223 : vector<16x1xf32>
      %225 = math.sqrt %224 : vector<16x1xf32>
      %cst_94 = arith.constant 9.99999974E-6 : f32
      %226 = vector.broadcast %cst_94 : f32 to vector<16x1xf32>
      %227 = arith.addf %225, %226 : vector<16x1xf32>
      %228 = tpu.reciprocal %227 {approx = true} : vector<16x1xf32> -> vector<16x1xf32>
      %229 = vector.broadcast %228 : vector<16x1xf32> to vector<16x32xf32>
      %230 = arith.mulf %219, %229 : vector<16x32xf32>
      %231 = vector.broadcast %212 : vector<1x32xf32> to vector<16x32xf32>
      %232 = arith.mulf %230, %231 : vector<16x32xf32>
      %233 = vector.broadcast %213 : vector<1x32xf32> to vector<16x32xf32>
      %234 = arith.addf %232, %233 : vector<16x32xf32>
      %235 = arith.truncf %234 : vector<16x32xf32> to vector<16x32xbf16>
      %c0_95 = arith.constant 0 : index
      %c0_96 = arith.constant 0 : index
      %236 = vector.load %arg7[%c0_95, %c0_96] : memref<32x128xbf16, #tpu.memory_space<vmem>>, vector<32x128xbf16>
      %cst_97 = arith.constant dense<0.000000e+00> : vector<16x128xf32>
      %237 = tpu.matmul %235, %236, %cst_97 {dimension_numbers = #tpu.dot_dimension_numbers<[1], [0], [0], [1], [0, 0, 1, 1], [], []>} : vector<16x32xbf16>, vector<32x128xbf16>, vector<16x128xf32> -> vector<16x128xf32>
      %c0_98 = arith.constant 0 : index
      %c0_99 = arith.constant 0 : index
      %238 = vector.load %arg20[%c0_98, %c0_99] : memref<16x128xf32, #tpu.memory_space<vmem>>, vector<16x128xf32>
      tpu.vector_store %arg20[%c0_98, %c0_99], %237 {strides = array<i32>} : memref<16x128xf32, #tpu.memory_space<vmem>>, vector<16x128xf32>,
    } else {
    }
    return
  }
  func.func @transform_0(%arg0: i32) -> (i32, i32) {
    %c0_i32 = arith.constant 0 : i32
    %c0_i32_0 = arith.constant 0 : i32
    %c0_i32_1 = arith.constant 0 : i32
    return %c0_i32, %c0_i32_0 : i32, i32
  }
  func.func @transform_1(%arg0: i32) -> (i32, i32) {
    %c0_i32 = arith.constant 0 : i32
    %c0_i32_0 = arith.constant 0 : i32
    %c0_i32_1 = arith.constant 0 : i32
    return %c0_i32, %c0_i32_0 : i32, i32
  }
  func.func @transform_2(%arg0: i32) -> (i32, i32) {
    %c0_i32 = arith.constant 0 : i32
    %c0_i32_0 = arith.constant 0 : i32
    %c0_i32_1 = arith.constant 0 : i32
    return %c0_i32, %c0_i32_0 : i32, i32
  }
  func.func @transform_3(%arg0: i32) -> (i32, i32) {
    %c0_i32 = arith.constant 0 : i32
    %c0_i32_0 = arith.constant 0 : i32
    %c0_i32_1 = arith.constant 0 : i32
    return %c0_i32, %c0_i32_0 : i32, i32
  }
  func.func @transform_4(%arg0: i32) -> (i32, i32) {
    %c0_i32 = arith.constant 0 : i32
    %c0_i32_0 = arith.constant 0 : i32
    %c0_i32_1 = arith.constant 0 : i32
    return %c0_i32, %c0_i32_0 : i32, i32
  }
  func.func @transform_5(%arg0: i32) -> (i32, i32) {
    %c0_i32 = arith.constant 0 : i32
    %c0_i32_0 = arith.constant 0 : i32
    %c0_i32_1 = arith.constant 0 : i32
    return %c0_i32, %c0_i32_0 : i32, i32
  }
  func.func @transform_6(%arg0: i32) -> (i32, i32) {
    %c0_i32 = arith.constant 0 : i32
    %c0_i32_0 = arith.constant 0 : i32
    %c0_i32_1 = arith.constant 0 : i32
    return %c0_i32, %c0_i32_0 : i32, i32
  }
  func.func @transform_7(%arg0: i32) -> (i32, i32, i32) {
    %c0_i32 = arith.constant 0 : i32
    %c0_i32_0 = arith.constant 0 : i32
    %c0_i32_1 = arith.constant 0 : i32
    return %arg0, %c0_i32, %c0_i32_0 : i32, i32, i32
  }
  func.func @transform_8(%arg0: i32) -> (i32, i32, i32) {
    %c0_i32 = arith.constant 0 : i32
    %c0_i32_0 = arith.constant 0 : i32
    %c0_i32_1 = arith.constant 0 : i32
    return %arg0, %c0_i32, %c0_i32_0 : i32, i32, i32
  }
  func.func @transform_9(%arg0: i32) -> (i32, i32, i32) {
    %c0_i32 = arith.constant 0 : i32
    %c0_i32_0 = arith.constant 0 : i32
    %c0_i32_1 = arith.constant 0 : i32
    return %arg0, %c0_i32, %c0_i32_0 : i32, i32, i32
  }
  func.func @transform_10(%arg0: i32) -> (i32, i32, i32) {
    %c0_i32 = arith.constant 0 : i32
    %c0_i32_0 = arith.constant 0 : i32
    %c0_i32_1 = arith.constant 0 : i32
    return %arg0, %c0_i32, %c0_i32_0 : i32, i32, i32
  }
  func.func @transform_11(%arg0: i32) -> (i32, i32, i32) {
    %c0_i32 = arith.constant 0 : i32
    %c0_i32_0 = arith.constant 0 : i32
    %c0_i32_1 = arith.constant 0 : i32
    return %arg0, %c0_i32, %c0_i32_0 : i32, i32, i32
  }
  func.func @transform_12(%arg0: i32) -> (i32, i32, i32) {
    %c0_i32 = arith.constant 0 : i32
    %c0_i32_0 = arith.constant 0 : i32
    %c0_i32_1 = arith.constant 0 : i32
    return %arg0, %c0_i32, %c0_i32_0 : i32, i32, i32
  }
  func.func @transform_13(%arg0: i32) -> (i32, i32, i32) {
    %c0_i32 = arith.constant 0 : i32
    %c0_i32_0 = arith.constant 0 : i32
    %c0_i32_1 = arith.constant 0 : i32
    return %arg0, %c0_i32, %c0_i32_0 : i32, i32, i32
  }
  func.func @transform_14(%arg0: i32) -> (i32, i32, i32) {
    %c0_i32 = arith.constant 0 : i32
    %c0_i32_0 = arith.constant 0 : i32
    %c0_i32_1 = arith.constant 0 : i32
    return %arg0, %c0_i32, %c0_i32_0 : i32, i32, i32
  }
  func.func @transform_15(%arg0: i32) -> (i32, i32, i32) {
    %c0_i32 = arith.constant 0 : i32
    %c0_i32_0 = arith.constant 0 : i32
    %c0_i32_1 = arith.constant 0 : i32
    return %arg0, %c0_i32, %c0_i32_0 : i32, i32, i32
  }
  func.func @transform_16(%arg0: i32) -> (i32, i32, i32) {
    %c0_i32 = arith.constant 0 : i32
    %c0_i32_0 = arith.constant 0 : i32
    %c0_i32_1 = arith.constant 0 : i32
    return %arg0, %c0_i32, %c0_i32_0 : i32, i32, i32
  }
  func.func @transform_17(%arg0: i32) -> (i32, i32, i32) {
    %c0_i32 = arith.constant 0 : i32
    %c0_i32_0 = arith.constant 0 : i32
    %c0_i32_1 = arith.constant 0 : i32
    return %arg0, %c0_i32, %c0_i32_0 : i32, i32, i32
  }
  func.func @transform_18(%arg0: i32) -> (i32, i32, i32) {
    %c0_i32 = arith.constant 0 : i32
    %c0_i32_0 = arith.constant 0 : i32
    %c0_i32_1 = arith.constant 0 : i32
    return %arg0, %c0_i32, %c0_i32_0 : i32, i32, i32
  }
  func.func @transform_19(%arg0: i32) -> (i32, i32) {
    %c0_i32 = arith.constant 0 : i32
    %c0_i32_0 = arith.constant 0 : i32
    %c0_i32_1 = arith.constant 0 : i32
    return %c0_i32, %c0_i32_0 : i32, i32
  }
}

</mosaic_0001>

<bundles_post_ra>
// kernel: gpt_forward.1
= control target key start
LH: loop header
LB: loop body
LE: loop exit
PB: predicated region body
PF: predicated region fallthrough
CT: control target
= control target key end

     0   :  { %s3418_s0 = inlined_call_operand.vmem [shape: s32[16,1], index: 0, kind: input, shape index: {}]   ;;  %s3419_s1 = inlined_call_operand.vmem [shape: bf16[64,32], index: 1, kind: input, shape index: {}]   ;;  %s3420_s2 = inlined_call_operand.vmem [shape: f32[8,32], index: 2, kind: input, shape index: {}]   ;;  %s3421_s3 = inlined_call_operand.vmem [shape: f32[8,8], index: 3, kind: input, shape index: {}]   ;;  %s3422_s4 = inlined_call_operand.vmem [shape: f32[1,32], index: 4, kind: input, shape index: {}]   ;;  %s3423_s5 = inlined_call_operand.vmem [shape: f32[1,32], index: 5, kind: input, shape index: {}]   ;;  %s3424_s6 = inlined_call_operand.vmem [shape: bf16[32,128], index: 6, kind: input, shape index: {}]   ;;  %s3425_s7 = inlined_call_operand.vmem [shape: f32[2,1,32], index: 7, kind: input, shape index: {}]   ;;  %s3426_s8 = inlined_call_operand.vmem [shape: f32[2,1,32], index: 8, kind: input, shape index: {}]   ;;  %s3427_s9 = inlined_call_operand.vmem [shape: bf16[2,32,96], index: 9, kind: input, shape index: {}]   ;;  %s3428_s10 = inlined_call_operand.vmem [shape: f32[2,1,96], index: 10, kind: input, shape index: {}]   ;;  %s3429_s11 = inlined_call_operand.vmem [shape: bf16[2,32,32], index: 11, kind: input, shape index: {}]   ;;  %s3430_s12 = inlined_call_operand.vmem [shape: f32[2,1,32], index: 12, kind: input, shape index: {}]   ;;  %s3431_s13 = inlined_call_operand.vmem [shape: f32[2,1,32], index: 13, kind: input, shape index: {}]   ;;  %s3432_s14 = inlined_call_operand.vmem [shape: f32[2,1,32], index: 14, kind: input, shape index: {}]   ;;  %s3433_s15 = inlined_call_operand.vmem [shape: bf16[2,32,128], index: 15, kind: input, shape index: {}]   ;;  %s3434_s16 = inlined_call_operand.vmem [shape: f32[2,1,128], index: 16, kind: input, shape index: {}]   ;;  %s3435_s17 = inlined_call_operand.vmem [shape: bf16[2,128,32], index: 17, kind: input, shape index: {}]   ;;  %s3436_s18 = inlined_call_operand.vmem [shape: f32[2,1,32], index: 18, kind: input, shape index: {}]   ;;  %s3437_s19 = inlined_call_operand.vmem [shape: f32[16,128], index: 19, kind: output, shape index: {}]  }
   0x1   :  { %3443 = sst [smem:[#allocation5_spill]] %s3418_s0  ;;  %s3043_s0 = smov 0  }
   0x2   :  { %3444 = sst [smem:[#allocation6_spill]] %s3419_s1 }
   0x3   :  { %3445 = sst [smem:[#allocation7_spill]] %s3420_s2 }
   0x4   :  { %3446 = sst [smem:[#allocation8_spill]] %s3421_s3 }
   0x5   :  { %3447 = sst [smem:[#allocation9_spill]] %s3422_s4 }
   0x6   :  { %3448 = sst [smem:[#allocation10_spill]] %s3423_s5 }
   0x7   :  { %3449 = sst [smem:[#allocation11_spill]] %s3424_s6 }
   0x8   :  { %3450 = sst [smem:[#allocation12_spill]] %s3427_s9 }
   0x9   :  { %3451 = sst [smem:[#allocation13_spill]] %s3429_s11 }
   0xa   :  { %3452 = sst [smem:[#allocation14_spill]] %s3437_s19 }
   0xb LB: > { %3453 = sst [smem:[#allocation4_spill]] %s2920_s0  ;;  %s3049_s30 = sadd.s32 4294967295, %s2920_s0   ;;  %s2920_s0 = sphi %s3043_s0, %s29_s0  }
   0xc   : > { %p2516_p0 = scmp.ge.s32.totalorder %s2920_s0, 1  ;;  %p626_p1 = scmp.lt.s32.totalorder %s2920_s0, 3 }
   0xe   : > { %p627_p2 = pnand %p2516_p0, %p626_p1 }
   0xf   : > { %p716_p3 = scmp.lt.s32.totalorder (!%p627_p2), %s3049_s30, 1  ;;  %s3454_s9 = sld [smem:[#allocation12_spill]] (!%p627_p2) }
  0x10   : > { %630 = sbr.rel (%p627_p2) target bundleno = 5113 (0x13f9), region = 96  ;;  %s3455_s11 = sld [smem:[#allocation13_spill]] (!%p627_p2) }
  0x11   : > { %p2525_p4 = scmp.ne.s32.totalorder (!%p627_p2), %s3049_s30, 0 }
  0x17   : > { %s3055_s20 = scalar_select %p716_p3, %s3049_s30, 1 }
  0x18   : > { %764 = sbr.rel (%p2525_p4) target bundleno = 384 (0x180), region = 100  ;;  %s3456_s28 = sld [smem:[#allocation5_spill]] (!%p2525_p4)  ;;  %v2922_v1 = vmov (!%p2525_p4), 0   ;;  %v2923_v2 = vmov (!%p2525_p4), 0.0   ;;  %vm2924_vm0 = vmmov (!%p2525_p4), 0   ;;  %v767_v8 = vlaneseq (!%p2525_p4) }
  0x19   : > { %s2582_s25 = sshll.u32 %s3055_s20, 4  ;;  %s740_s4 = scalar_lea.vmem %s3431_s13, %s3055_s20  ;;  %2833 = vset.pattern.permute.xlu0 (!%p2525_p4), %v2922_v1  ;;  %2644 = vmatprep.subr.bf16.mxu0 (!%p2525_p4), %v2923_v2  ;;  %vm815_vm3 = vcmask (!%p2525_p4), 523264   ;;  %vm860_vm4 = vcmask (!%p2525_p4), 261120  }
  0x1a   : > { %s3073_s21 = scalar_lea.vmem %s3454_s9, %s2582_s25  ;;  %s3078_s19 = scalar_lea.vmem %s3455_s11, %s2582_s25  ;;  %2652 = vmatprep.mubr.msk.bf16.mxu0 (!%p2525_p4), %vm2924_vm0, %v2923_v2  ;;  %v768_v9 = vand.u32 (!%p2525_p4), 127, %v767_v8 }
  0x1b   : > { %s743_s27 = scalar_lea.vmem %s3432_s14, %s3055_s20  ;;  %s3095_s9 = scalar_lea.vmem %s3433_s15, %s2582_s25 }
  0x1c   : > { %s751_s11 = scalar_lea.vmem %s3434_s16, %s3055_s20  ;;  %s2585_s6 = sshll.u32 %s3055_s20, 6 }
  0x1d   : > { %s3105_s2 = scalar_lea.vmem %s3435_s17, %s2585_s6  ;;  %s759_s3 = scalar_lea.vmem %s3436_s18, %s3055_s20 }
  0x1e   : > { %v765_v0 = vld [vmem:[%s3456_s28] sm:$0xff] (!%p2525_p4)  ;;  %s3457_s1 = sld [smem:[#allocation6_spill]] (!%p2525_p4)  ;;  %v766_v4 = vld [vmem:[%s3456_s28 + $0x8] sm:$0xff] (!%p2525_p4)  ;;  %s3458_s5 = sld [smem:[#allocation7_spill]] (!%p2525_p4) }
  0x1f   : > { %770 = vperm.xlu0 %2833, %v765_v0  }
  0x23   : > { %773 = vperm.xlu0 %2833, %v766_v4  }
  0x24   : > { %v2834_v3 = vld [vmem:[%s3457_s1] sm:$0xff]   ;;  %v2835_v5 = vld [vmem:[%s3457_s1 + $0x8] sm:$0xff]   ;;  %v2836_v6 = vld [vmem:[%s3457_s1 + $0x10] sm:$0xff]  }
  0x25   : > { %2645 = vmatpush3.bf16.msra.mxu0 %v2834_v3  ;;  %v2837_v7 = vld [vmem:[%s3457_s1 + $0x18] sm:$0xff]   ;;  %v790_v15 = vld [vmem:[%s3458_s5] sm:$0xff] }
  0x26   : > { %2646 = vmatprep.subr.bf16.mxu0 %v2923_v2 }
  0x29   : > { %2647 = vmatpush3.bf16.msra.mxu0 %v2835_v5 }
  0x2a   : > { %2648 = vmatprep.subr.bf16.mxu0 %v2923_v2 }
  0x2d   : > { %2649 = vmatpush3.bf16.msra.mxu0 %v2836_v6 }
  0x2e   : > { %2650 = vmatprep.subr.bf16.mxu0 %v2923_v2 }
  0x31   : > { %2651 = vmatpush3.bf16.msra.mxu0 %v2837_v7 }
  0x9e   : > { %v771_v10 = vpop.permute.xlu0 %770 }
  0x9f   : > { %vm775_vm1 = vcmp.eq.s32.totalorder %v768_v9, %v771_v10 }
  0xa0   : > { %v2526_v12 = vsel %vm775_vm1, 1.0, %v2923_v2 }
  0xa2   : > { %v774_v11 = vpop.permute.xlu0 %773 }
  0xa3   : > { %vm776_vm2 = vcmp.eq.s32.totalorder %v768_v9, %v774_v11 }
  0xa4   : > { %v2527_v13 = vsel %vm776_vm2, 1.0, %v2923_v2 }
  0xa5   : > { %v781_v14 = vpack.c.bf16 %v2527_v13, %v2526_v12 }
  0xa7   : > { %2653 = vmatmul.mubr.msk.bf16.vlgmr.msra.gmra.mrb[0].mxu0 %vm815_vm3, %v781_v14 }
 0x17a   : > { %v853_v16 = vpop.f32.mrb[0].mxu0 }
 0x17b   : > { %v854_v17 = vadd.f32 %v853_v16, %v790_v15  ;;  %v2654_v18 = vpop.f32.mrb[1].mxu0 }
 0x17c   : > { %v856_v19 = vpop.f32.mrb[2].mxu0 }
 0x17d   : > { %861 = vst.msk [vmem:[#allocation2] sm:$0xff] %vm860_vm4, %v854_v17  ;;  %v857_v20 = vadd.f32 %v856_v19, %v790_v15  ;;  %v2655_v21 = vpop.f32.mrb[3].mxu0 }
 0x17f   : > { %862 = vst.msk [vmem:[#allocation2 + $0x8] sm:$0xff] %vm860_vm4, %v857_v20 }
 0x180 PF: > { %vm867_vm5 = vcmask 261120   ;;  %v2838_v36 = vld [vmem:[%s3073_s21] sm:$0xff]   ;;  %v2925_v37 = vmov 0.0   ;;  %vm2926_vm6 = vmmov 0   ;;  %v2839_v38 = vld [vmem:[%s3073_s21 + $0x8] sm:$0xff]   ;;  %s3459_s24 = scalar_lea.vmem %s3425_s7, %s3055_s20  ;;  %s3460_s25 = scalar_lea.vmem %s3426_s8, %s3055_s20  ;;  %vm999_vm11 = vcmask 64512  }
 0x181   : > { %2656 = vmatprep.subr.bf16.mxu0 %v2925_v37  ;;  %2660 = vmatprep.mubr.msk.bf16.mxu0 %vm2926_vm6, %v2925_v37  ;;  %v2533_v57 = vld [vmem:[%s3459_s24] ss:$0 sm:$0xff]  ;;  %s3461_s6 = scalar_lea.vmem %s3428_s10, %s3055_s20  ;;  %s2927_s5 = smov 96   ;;  %vm1128_vm12 = vcmask 1043456   ;;  %vm1454_vm13 = vcmask 130112   ;;  %vm1689_vm14 = vcmask 195712  }
 0x182   : > { %2657 = vmatpush3.bf16.msra.mxu0 %v2838_v36  ;;  %2676 = vmatprep.subr.bf16.mxu1 %v2925_v37  ;;  %v2534_v61 = vld [vmem:[%s3460_s25] ss:$0 sm:$0xff]  ;;  %s3462_s24 = sld [smem:[#allocation8_spill]]  ;;  %s2928_s23 = smov 64   ;;  %vm1924_vm15 = vcmask 261312  }
 0x183   : > { %2658 = vmatprep.subr.bf16.mxu0 %v2925_v37  ;;  %2678 = vmatprep.mubr.msk.bf16.mxu1 %vm2926_vm6, %v2925_v37  ;;  %v2535_v2 = vld [vmem:[%s3461_s6] ss:$0 sm:$0xff]  ;;  %s2929_s26 = smov 88   ;;  %s2930_s25 = smov 120  }
 0x184   : > { %v3133_v22 = vld [vmem:[#allocation2] sm:$0xff]  ;;  %s2931_s29 = smov 56   ;;  %s2932_s0 = smov 80  }
 0x185   : > { %v868_v24 = vsel %vm867_vm5, %v3133_v22, 0.0  ;;  %s2933_s6 = smov 112   ;;  %s2935_s21 = smov 72  }
 0x186   : > { %v3135_v23 = vld [vmem:[#allocation2 + $0x8] sm:$0xff]  ;;  %869 = vadd.xlane.f32.xlu0 %v868_v24  ;;  %2659 = vmatpush3.bf16.msra.mxu0 %v2839_v38  ;;  %s2936_s22 = smov 104   ;;  %p2574_p5 = scmp.ne.s32.totalorder %s3049_s30, 1 }
 0x187   : > { %v871_v25 = vsel %vm867_vm5, %v3135_v23, 0.0  ;;  %2664 = vmatprep.subr.bf16.mxu0 %v2925_v37  ;;  %vm2942_vm4 = vmmov (!%p2574_p5), 0  }
 0x188   : > { %v3194_v16 = vld [vmem:[%s3462_s24] sm:$0xff]  ;;  %s2937_s24 = smov 40  }
 0x18a   : > { %872 = vadd.xlane.f32.xlu0 %v871_v25 }
 0x213   : > { %v870_v26 = vpop.xlane.xlu0 %869 }
 0x214   : > { %v875_v27 = vmul.f32 0.03125, %v870_v26 }
 0x216   : > { %v877_v28 = vsub.f32 %v3133_v22, %v875_v27 }
 0x217   : > { %v873_v29 = vpop.xlane.xlu0 %872 }
 0x218   : > { %v876_v30 = vmul.f32 0.03125, %v873_v29  ;;  %v879_v31 = vmul.f32 %v877_v28, %v877_v28 }
 0x21a   : > { %v878_v32 = vsub.f32 %v3135_v23, %v876_v30  ;;  %v881_v33 = vsel %vm867_vm5, %v879_v31, 0.0 }
 0x21b   : > { %882 = vadd.xlane.f32.xlu1 %v881_v33 }
 0x21c   : > { %v880_v34 = vmul.f32 %v878_v32, %v878_v32 }
 0x21e   : > { %v884_v35 = vsel %vm867_vm5, %v880_v34, 0.0 }
 0x21f   : > { %885 = vadd.xlane.f32.xlu1 %v884_v35 }
 0x2a8   : > { %v883_v39 = vpop.xlane.xlu1 %882 }
 0x2a9   : > { %v887_v40 = vmul.f32 0.032258064, %v883_v39 }
 0x2ab   : > { %2852 = vrsqrt.f32 %v887_v40  ;;  %vm891_vm7 = vcmp.eq.f32.partialorder %v887_v40, inf  ;;  %v894_v45 = vand.u32 2147483648, %v887_v40  ;;  %vm893_vm8 = vcmp.eq.f32.partialorder %v887_v40, 0.0 }
 0x2ac   : > { %v886_v41 = vpop.xlane.xlu1 %885 }
 0x2ad   : > { %v888_v42 = vmul.f32 0.032258064, %v886_v41 }
 0x2af   : > { %2854 = vrsqrt.f32 %v888_v42  ;;  %vm898_vm9 = vcmp.eq.f32.partialorder %v888_v42, inf  ;;  %v901_v51 = vand.u32 2147483648, %v888_v42  ;;  %vm900_vm10 = vcmp.eq.f32.partialorder %v888_v42, 0.0 }
 0x2b5   : > { %v2853_v43 = vpop.eup %2852 }
 0x2b6   : > { %v890_v44 = vmul.f32 %v2853_v43, %v887_v40 }
 0x2b8   : > { %v892_v46 = vsel %vm891_vm7, %v887_v40, %v890_v44 }
 0x2b9   : > { %v2855_v47 = vpop.eup %2854  ;;  %v895_v48 = vsel %vm893_vm8, %v894_v45, %v892_v46 }
 0x2ba   : > { %v903_v49 = vadd.f32 1e-05, %v895_v48  ;;  %v897_v50 = vmul.f32 %v2855_v47, %v888_v42 }
 0x2bc   : > { %2856 = vrcp.f32 %v903_v49  ;;  %v899_v52 = vsel %vm898_vm9, %v888_v42, %v897_v50 }
 0x2bd   : > { %v902_v53 = vsel %vm900_vm10, %v901_v51, %v899_v52 }
 0x2be   : > { %v904_v54 = vadd.f32 1e-05, %v902_v53 }
 0x2c0   : > { %2858 = vrcp.f32 %v904_v54 }
 0x2c6   : > { %v2857_v55 = vpop.eup %2856 }
 0x2c7   : > { %v907_v56 = vmul.f32 %v2857_v55, %v877_v28 }
 0x2c9   : > { %v915_v60 = vmul.f32 %v2533_v57, %v907_v56 }
 0x2ca   : > { %v2859_v58 = vpop.eup %2858 }
 0x2cb   : > { %v908_v59 = vmul.f32 %v2859_v58, %v878_v32  ;;  %v923_v63 = vadd.f32 %v2534_v61, %v915_v60 }
 0x2cd   : > { %v916_v62 = vmul.f32 %v2533_v57, %v908_v59 }
 0x2cf   : > { %v924_v0 = vadd.f32 %v2534_v61, %v916_v62 }
 0x2d1   : > { %v925_v1 = vpack.c.bf16 %v924_v0, %v923_v63 }
 0x2d3   : > { %2661 = vmatmul.mubr.msk.bf16.vlgmr.msra.gmra.mrb[0].mxu0 %vm867_vm5, %v925_v1 }
 0x2d4   : > { %2666 = vmatprep.mubr.msk.bf16.mxu0 %vm2926_vm6, %v2925_v37 }
 0x3a6   : > { %v986_v3 = vpop.f32.mrb[0].mxu0 }
 0x3a7   : > { %v987_v4 = vadd.f32 %v2535_v2, %v986_v3  ;;  %v2662_v5 = vpop.f32.mrb[1].mxu0 }
 0x3a8   : > { %v989_v6 = vpop.f32.mrb[2].mxu0 }
 0x3a9   : > { %v3173_v7 = vpack.c.bf16 %v987_v4, %v987_v4  ;;  %v990_v8 = vadd.f32 %v2535_v2, %v989_v6  ;;  %v2663_v9 = vpop.f32.mrb[3].mxu0 }
 0x3ab   : > { %v3175_v10 = vpack.c.bf16 %v990_v8, %v990_v8  ;;  %997 = vrot.lane.b32.xlu0 %v3173_v7, %s2927_s5 }
 0x3ad   : > { %1047 = vrot.lane.b32.xlu1 %v3175_v10, %s2927_s5  ;;  %s2934_s5 = smov 48  }
 0x41d   : > { %v998_v11 = vpop.permute.xlu0 %997 }
 0x41e   : > { %v1004_v12 = vsel %vm999_vm11, %v998_v11, 0 }
 0x41f   : > { %2665 = vmatpush3.bf16.xpose.msra.mxu0 %v1004_v12  ;;  %v1048_v13 = vpop.permute.xlu1 %1047 }
 0x420   : > { %2670 = vmatprep.subr.bf16.mxu0 %v2925_v37  ;;  %v1053_v14 = vsel %vm999_vm11, %v1048_v13, 0 }
 0x426   : > { %2667 = vmatmul.mubr.msk.bf16.vlgmr.msra.gmra.mrb[4].mxu0 %vm999_vm11, %v3173_v7 }
 0x427   : > { %2671 = vmatpush3.bf16.xpose.msra.mxu0 %v1053_v14  ;;  %2672 = vmatprep.mubr.msk.bf16.mxu0 %vm2926_vm6, %v2925_v37 }
 0x428   : > { %2682 = vmatprep.subr.bf16.mxu0 %v2925_v37 }
 0x42e   : > { %2673 = vmatmul.mubr.msk.bf16.vlgmr.msra.gmra.mrb[8].mxu0 %vm999_vm11, %v3175_v10 }
 0x42f   : > { %2684 = vmatprep.mubr.msk.bf16.mxu0 %vm2926_vm6, %v2925_v37 }
 0x4f9   : > { %v1040_v15 = vpop.f32.mrb[4].mxu0 }
 0x4fa   : > { %v1095_v17 = vmul.f32 0.35355338, %v1040_v15  ;;  %v2668_v18 = vpop.f32.mrb[5].mxu0 }
 0x4fb   : > { %v1043_v19 = vpop.f32.mrb[6].mxu0 }
 0x4fc   : > { %v2669_v20 = vpop.f32.mrb[7].mxu0  ;;  %v1097_v21 = vadd.f32 %v1095_v17, %v3194_v16 }
 0x4fe   : > { %v1099_v24 = vsel %vm999_vm11, %v1097_v21, -inf }
 0x4ff   : > { %1100 = vmax.xlane.f32.xlu1 %v1099_v24 }
 0x501   : > { %v1089_v25 = vpop.f32.mrb[8].mxu0 }
 0x502   : > { %v1096_v26 = vmul.f32 0.35355338, %v1089_v25  ;;  %v2674_v27 = vpop.f32.mrb[9].mxu0 }
 0x503   : > { %v1092_v28 = vpop.f32.mrb[10].mxu0 }
 0x504   : > { %v2675_v29 = vpop.f32.mrb[11].mxu0  ;;  %v1098_v30 = vadd.f32 %v1096_v26, %v3194_v16 }
 0x506   : > { %v1102_v31 = vsel %vm999_vm11, %v1098_v30, -inf }
 0x507   : > { %1103 = vmax.xlane.f32.xlu0 %v1102_v31 }
 0x510   : > { %1172 = vrot.lane.b32.xlu1 %v3175_v10, %s2928_s23 }
 0x514   : > { %1224 = vrot.lane.b32.xlu1 %v3173_v7, %s2929_s26 }
 0x58c   : > { %v1101_v32 = vpop.xlane.xlu1 %1100 }
 0x58d   : > { %v1105_v33 = vsub.f32 %v1097_v21, %v1101_v32 }
 0x58f   : > { %v1107_v34 = vmul.f32 1.442695, %v1105_v33 }
 0x590   : > { %v1173_v35 = vpop.permute.xlu1 %1172 }
 0x591   : > { %2860 = vpow2.f32 %v1107_v34  ;;  %v1178_v36 = vsel %vm1128_vm12, %v1173_v35, 0 }
 0x592   : > { %2683 = vmatpush3.bf16.msra.mxu0 %v1178_v36 }
 0x593   : > { %2694 = vmatprep.subr.bf16.mxu0 %v2925_v37 }
 0x594   : > { %v1104_v38 = vpop.xlane.xlu0 %1103  ;;  %v1225_v46 = vpop.permute.xlu1 %1224 }
 0x595   : > { %v1106_v39 = vsub.f32 %v1098_v30, %v1104_v38  ;;  %v1230_v53 = vsel %vm999_vm11, %v1225_v46, 0 }
 0x597   : > { %v1109_v40 = vmul.f32 1.442695, %v1106_v39 }
 0x599   : > { %2862 = vpow2.f32 %v1109_v40 }
 0x59b   : > { %v2861_v41 = vpop.eup %2860 }
 0x59c   : > { %v1111_v42 = vsel %vm999_vm11, %v2861_v41, 0.0 }
 0x59d   : > { %1112 = vadd.xlane.f32.xlu0 %v1111_v42 }
 0x5a3   : > { %v2863_v43 = vpop.eup %2862 }
 0x5a4   : > { %v1114_v44 = vsel %vm999_vm11, %v2863_v43, 0.0 }
 0x5a5   : > { %1115 = vadd.xlane.f32.xlu1 %v1114_v44 }
 0x5b3   : > { %1123 = vrot.lane.b32.xlu0 %v3173_v7, %s2928_s23  ;;  %s2938_s23 = smov 8  }
 0x5b6   : > { %1274 = vrot.lane.b32.xlu1 %v3175_v10, %s2929_s26  ;;  %s2939_s26 = smov 16  }
 0x5b7   : > { %1222 = vrot.lane.b32.xlu0 %v3173_v7, %s2930_s25 }
 0x5ba   : > { %1272 = vrot.lane.b32.xlu1 %v3175_v10, %s2930_s25  ;;  %s2940_s25 = smov 24  }
 0x62a   : > { %v1113_v45 = vpop.xlane.xlu0 %1112 }
 0x62b   : > { %2864 = vrcp.f32 %v1113_v45 }
 0x62e   : > { %v1124_v47 = vpop.permute.xlu0 %1123 }
 0x62f   : > { %v1130_v48 = vsel %vm1128_vm12, %v1124_v47, 0 }
 0x630   : > { %2677 = vmatpush3.bf16.msra.mxu1 %v1130_v48 }
 0x631   : > { %2688 = vmatprep.subr.bf16.mxu1 %v2925_v37 }
 0x632   : > { %v1116_v49 = vpop.xlane.xlu1 %1115  ;;  %v1223_v58 = vpop.permute.xlu0 %1222 }
 0x633   : > { %2866 = vrcp.f32 %v1116_v49 }
 0x635   : > { %v2865_v50 = vpop.eup %2864 }
 0x636   : > { %v1119_v51 = vmul.f32 %v2865_v50, %v2861_v41  ;;  %v1275_v56 = vpop.permute.xlu1 %1274 }
 0x637   : > { %v1280_v59 = vsel %vm999_vm11, %v1275_v56, 0 }
 0x638   : > { %v1121_v52 = vpack.c.bf16 %v1119_v51, %v1119_v51 }
 0x63a   : > { %2679 = vmatmul.mubr.msk.bf16.vlgmr.msra.gmra.mrb[0].mxu1 %vm999_vm11, %v1121_v52  ;;  %v1273_v60 = vpop.permute.xlu1 %1272 }
 0x63b   : > { %2689 = vmatpush3.bf16.xpose.msra.mxu1 %v1230_v53  ;;  %2690 = vmatprep.mubr.msk.bf16.mxu1 %vm2926_vm6, %v2925_v37 }
 0x63c   : > { %2700 = vmatprep.subr.bf16.mxu1 %v2925_v37 }
 0x63d   : > { %v2867_v54 = vpop.eup %2866 }
 0x63e   : > { %v1120_v55 = vmul.f32 %v2867_v54, %v2863_v43 }
 0x640   : > { %v1122_v57 = vpack.c.bf16 %v1120_v55, %v1120_v55 }
 0x642   : > { %2685 = vmatmul.mubr.msk.bf16.vlgmr.msra.gmra.mrb[12].mxu0 %vm999_vm11, %v1122_v57  ;;  %2691 = vmatmul.mubr.msk.bf16.vlgmr.msra.gmra.mrb[4].mxu1 %vm999_vm11, %v1223_v58 }
 0x643   : > { %2695 = vmatpush3.bf16.xpose.msra.mxu0 %v1280_v59  ;;  %2696 = vmatprep.mubr.msk.bf16.mxu0 %vm2926_vm6, %v2925_v37 }
 0x644   : > { %2706 = vmatprep.subr.bf16.mxu0 %v2925_v37  ;;  %2702 = vmatprep.mubr.msk.bf16.mxu1 %vm2926_vm6, %v2925_v37 }
 0x64a   : > { %2697 = vmatmul.mubr.msk.bf16.vlgmr.msra.gmra.mrb[16].mxu0 %vm999_vm11, %v1273_v60 }
 0x64b   : > { %2708 = vmatprep.mubr.msk.bf16.mxu0 %vm2926_vm6, %v2925_v37 }
 0x70d   : > { %v1166_v61 = vpop.f32.mrb[0].mxu1 }
 0x70e   : > { %1220 = vst.msk [vmem:[#allocation3] sm:$0xff] %vm999_vm11, %v1166_v61  ;;  %v2680_v62 = vpop.f32.mrb[1].mxu1 }
 0x70f   : > { %v1169_v63 = vpop.f32.mrb[2].mxu1 }
 0x710   : > { %v2681_v0 = vpop.f32.mrb[3].mxu1 }
 0x715   : > { %v1214_v1 = vpop.f32.mrb[12].mxu0  ;;  %v1266_v2 = vpop.f32.mrb[4].mxu1 }
 0x716   : > { %1221 = vst.msk [vmem:[#allocation3 + $0x8] sm:$0xff] %vm999_vm11, %v1214_v1  ;;  %v1322_v3 = vmul.f32 0.35355338, %v1266_v2  ;;  %v2686_v4 = vpop.f32.mrb[13].mxu0  ;;  %v2692_v5 = vpop.f32.mrb[5].mxu1 }
 0x717   : > { %v1217_v6 = vpop.f32.mrb[14].mxu0  ;;  %v1269_v8 = vpop.f32.mrb[6].mxu1 }
 0x718   : > { %v2687_v9 = vpop.f32.mrb[15].mxu0  ;;  %v2693_v11 = vpop.f32.mrb[7].mxu1  ;;  %v1324_v12 = vadd.f32 %v1322_v3, %v3194_v16 }
 0x71a   : > { %v1326_v13 = vsel %vm999_vm11, %v1324_v12, -inf }
 0x71b   : > { %1327 = vmax.xlane.f32.xlu0 %v1326_v13 }
 0x71d   : > { %v1316_v14 = vpop.f32.mrb[16].mxu0 }
 0x71e   : > { %v1323_v15 = vmul.f32 0.35355338, %v1316_v14  ;;  %v2698_v17 = vpop.f32.mrb[17].mxu0 }
 0x71f   : > { %v1319_v18 = vpop.f32.mrb[18].mxu0 }
 0x720   : > { %v2699_v19 = vpop.f32.mrb[19].mxu0  ;;  %v1325_v20 = vadd.f32 %v1323_v15, %v3194_v16 }
 0x722   : > { %v1329_v21 = vsel %vm999_vm11, %v1325_v20, -inf }
 0x723   : > { %1330 = vmax.xlane.f32.xlu1 %v1329_v21 }
 0x734   : > { %1398 = vrot.lane.b32.xlu1 %v3175_v10, %s2931_s29 }
 0x738   : > { %1459 = vrot.lane.b32.xlu1 %v3173_v7, %s2932_s0 }
 0x73c   : > { %1509 = vrot.lane.b32.xlu1 %v3175_v10, %s2932_s0  ;;  %s3463_s0 = scalar_lea.vmem %s3430_s12, %s3055_s20 }
 0x740   : > { %1507 = vrot.lane.b32.xlu1 %v3175_v10, %s2933_s6 }
 0x7a8   : > { %v1328_v24 = vpop.xlane.xlu0 %1327 }
 0x7a9   : > { %v1332_v25 = vsub.f32 %v1324_v12, %v1328_v24 }
 0x7ab   : > { %v1334_v26 = vmul.f32 1.442695, %v1332_v25 }
 0x7ad   : > { %2868 = vpow2.f32 %v1334_v26 }
 0x7b0   : > { %v1331_v27 = vpop.xlane.xlu1 %1330 }
 0x7b1   : > { %v1333_v28 = vsub.f32 %v1325_v20, %v1331_v27 }
 0x7b3   : > { %v1336_v29 = vmul.f32 1.442695, %v1333_v28 }
 0x7b4   : > { %v1399_v30 = vpop.permute.xlu1 %1398 }
 0x7b5   : > { %2870 = vpow2.f32 %v1336_v29  ;;  %v1404_v31 = vsel %vm1128_vm12, %v1399_v30, 0 }
 0x7b6   : > { %2707 = vmatpush3.bf16.msra.mxu0 %v1404_v31 }
 0x7b7   : > { %v2869_v32 = vpop.eup %2868  ;;  %2718 = vmatprep.subr.bf16.mxu0 %v2925_v37 }
 0x7b8   : > { %v1338_v33 = vsel %vm999_vm11, %v2869_v32, 0.0  ;;  %v1460_v44 = vpop.permute.xlu1 %1459 }
 0x7b9   : > { %1339 = vadd.xlane.f32.xlu0 %v1338_v33  ;;  %v1465_v48 = vsel %vm999_vm11, %v1460_v44, 0 }
 0x7bc   : > { %v1510_v47 = vpop.permute.xlu1 %1509 }
 0x7bd   : > { %v1515_v50 = vsel %vm999_vm11, %v1510_v47, 0 }
 0x7bf   : > { %v2871_v34 = vpop.eup %2870 }
 0x7c0   : > { %v1341_v35 = vsel %vm999_vm11, %v2871_v34, 0.0  ;;  %v1508_v52 = vpop.permute.xlu1 %1507 }
 0x7c1   : > { %1342 = vadd.xlane.f32.xlu0 %v1341_v35 }
 0x7d7   : > { %1350 = vrot.lane.b32.xlu0 %v3173_v7, %s2931_s29 }
 0x7db   : > { %1457 = vrot.lane.b32.xlu0 %v3173_v7, %s2933_s6 }
 0x846   : > { %v1340_v36 = vpop.xlane.xlu0 %1339 }
 0x847   : > { %2872 = vrcp.f32 %v1340_v36 }
 0x84e   : > { %v1343_v38 = vpop.xlane.xlu0 %1342 }
 0x84f   : > { %2874 = vrcp.f32 %v1343_v38 }
 0x851   : > { %v2873_v39 = vpop.eup %2872 }
 0x852   : > { %v1346_v40 = vmul.f32 %v2873_v39, %v2869_v32  ;;  %v1351_v41 = vpop.permute.xlu0 %1350 }
 0x853   : > { %v1356_v42 = vsel %vm1128_vm12, %v1351_v41, 0 }
 0x854   : > { %2701 = vmatpush3.bf16.msra.mxu1 %v1356_v42  ;;  %v1348_v43 = vpack.c.bf16 %v1346_v40, %v1346_v40 }
 0x855   : > { %2712 = vmatprep.subr.bf16.mxu1 %v2925_v37 }
 0x856   : > { %v1458_v51 = vpop.permute.xlu0 %1457 }
 0x857   : > { %2703 = vmatmul.mubr.msk.bf16.vlgmr.msra.gmra.mrb[8].mxu1 %vm999_vm11, %v1348_v43 }
 0x858   : > { %2714 = vmatprep.mubr.msk.bf16.mxu1 %vm2926_vm6, %v2925_v37 }
 0x859   : > { %v2875_v45 = vpop.eup %2874 }
 0x85a   : > { %v1347_v46 = vmul.f32 %v2875_v45, %v2871_v34 }
 0x85c   : > { %v1349_v49 = vpack.c.bf16 %v1347_v46, %v1347_v46 }
 0x85d   : > { %2713 = vmatpush3.bf16.xpose.msra.mxu1 %v1465_v48 }
 0x85e   : > { %2709 = vmatmul.mubr.msk.bf16.vlgmr.msra.gmra.mrb[20].mxu0 %vm999_vm11, %v1349_v49  ;;  %2724 = vmatprep.subr.bf16.mxu1 %v2925_v37 }
 0x85f   : > { %2719 = vmatpush3.bf16.xpose.msra.mxu0 %v1515_v50  ;;  %2720 = vmatprep.mubr.msk.bf16.mxu0 %vm2926_vm6, %v2925_v37 }
 0x860   : > { %2730 = vmatprep.subr.bf16.mxu0 %v2925_v37 }
 0x864   : > { %2715 = vmatmul.mubr.msk.bf16.vlgmr.msra.gmra.mrb[12].mxu1 %vm999_vm11, %v1458_v51 }
 0x865   : > { %2726 = vmatprep.mubr.msk.bf16.mxu1 %vm2926_vm6, %v2925_v37 }
 0x866   : > { %2721 = vmatmul.mubr.msk.bf16.vlgmr.msra.gmra.mrb[24].mxu0 %vm999_vm11, %v1508_v52 }
 0x867   : > { %2732 = vmatprep.mubr.msk.bf16.mxu0 %vm2926_vm6, %v2925_v37 }
 0x92a   : > { %v3262_v53 = vpop.f32.mrb[8].mxu1 }
 0x92b   : > { %v2704_v54 = vpop.f32.mrb[9].mxu1 }
 0x92c   : > { %v1395_v55 = vpop.f32.mrb[10].mxu1 }
 0x92d   : > { %v2705_v56 = vpop.f32.mrb[11].mxu1 }
 0x931   : > { %v3264_v57 = vpop.f32.mrb[20].mxu0 }
 0x932   : > { %v2710_v58 = vpop.f32.mrb[21].mxu0 }
 0x933   : > { %v1443_v59 = vpop.f32.mrb[22].mxu0 }
 0x934   : > { %v2711_v60 = vpop.f32.mrb[23].mxu0 }
 0x937   : > { %v1501_v61 = vpop.f32.mrb[12].mxu1 }
 0x938   : > { %v1557_v62 = vmul.f32 0.35355338, %v1501_v61  ;;  %v2716_v63 = vpop.f32.mrb[13].mxu1 }
 0x939   : > { %v1504_v0 = vpop.f32.mrb[14].mxu1  ;;  %v1551_v1 = vpop.f32.mrb[24].mxu0 }
 0x93a   : > { %v1558_v2 = vmul.f32 0.35355338, %v1551_v1  ;;  %v2717_v3 = vpop.f32.mrb[15].mxu1  ;;  %v2722_v4 = vpop.f32.mrb[25].mxu0  ;;  %v1559_v5 = vadd.f32 %v1557_v62, %v3194_v16 }
 0x93b   : > { %v1554_v6 = vpop.f32.mrb[26].mxu0 }
 0x93c   : > { %v2723_v8 = vpop.f32.mrb[27].mxu0  ;;  %v1561_v9 = vsel %vm999_vm11, %v1559_v5, -inf  ;;  %v1560_v11 = vadd.f32 %v1558_v2, %v3194_v16 }
 0x93d   : > { %1562 = vmax.xlane.f32.xlu0 %v1561_v9 }
 0x93e   : > { %v1564_v12 = vsel %vm999_vm11, %v1560_v11, -inf }
 0x93f   : > { %1565 = vmax.xlane.f32.xlu1 %v1564_v12 }
 0x950   : > { %1633 = vrot.lane.b32.xlu1 %v3175_v10, %s2934_s5 }
 0x954   : > { %1694 = vrot.lane.b32.xlu1 %v3173_v7, %s2935_s21 }
 0x958   : > { %1744 = vrot.lane.b32.xlu1 %v3175_v10, %s2935_s21 }
 0x95c   : > { %1742 = vrot.lane.b32.xlu1 %v3175_v10, %s2936_s22 }
 0x9ca   : > { %v1563_v13 = vpop.xlane.xlu0 %1562 }
 0x9cb   : > { %v1567_v14 = vsub.f32 %v1559_v5, %v1563_v13 }
 0x9cc   : > { %v1566_v15 = vpop.xlane.xlu1 %1565 }
 0x9cd   : > { %v1569_v17 = vmul.f32 1.442695, %v1567_v14  ;;  %v1568_v18 = vsub.f32 %v1560_v11, %v1566_v15 }
 0x9cf   : > { %2876 = vpow2.f32 %v1569_v17  ;;  %v1571_v19 = vmul.f32 1.442695, %v1568_v18 }
 0x9d0   : > { %v1634_v20 = vpop.permute.xlu1 %1633 }
 0x9d1   : > { %2878 = vpow2.f32 %v1571_v19  ;;  %v1639_v21 = vsel %vm1128_vm12, %v1634_v20, 0 }
 0x9d2   : > { %2731 = vmatpush3.bf16.msra.mxu0 %v1639_v21 }
 0x9d3   : > { %2742 = vmatprep.subr.bf16.mxu0 %v2925_v37 }
 0x9d4   : > { %v1695_v33 = vpop.permute.xlu1 %1694 }
 0x9d5   : > { %v1700_v40 = vsel %vm999_vm11, %v1695_v33, 0 }
 0x9d8   : > { %v1745_v39 = vpop.permute.xlu1 %1744 }
 0x9d9   : > { %v2877_v24 = vpop.eup %2876  ;;  %v1750_v42 = vsel %vm999_vm11, %v1745_v39, 0 }
 0x9da   : > { %v1573_v25 = vsel %vm999_vm11, %v2877_v24, 0.0 }
 0x9db   : > { %v2879_v26 = vpop.eup %2878  ;;  %1574 = vadd.xlane.f32.xlu0 %v1573_v25 }
 0x9dc   : > { %v1576_v27 = vsel %vm999_vm11, %v2879_v26, 0.0  ;;  %v1743_v44 = vpop.permute.xlu1 %1742 }
 0x9df   : > { %1577 = vadd.xlane.f32.xlu0 %v1576_v27 }
 0x9f5   : > { %1585 = vrot.lane.b32.xlu0 %v3173_v7, %s2934_s5  ;;  %s3467_s5 = sld [smem:[#allocation14_spill]] (!%p2574_p5) }
 0x9f9   : > { %1692 = vrot.lane.b32.xlu0 %v3173_v7, %s2936_s22 }
 0xa68   : > { %v1575_v28 = vpop.xlane.xlu0 %1574 }
 0xa69   : > { %2880 = vrcp.f32 %v1575_v28 }
 0xa6c   : > { %v1578_v29 = vpop.xlane.xlu0 %1577 }
 0xa6d   : > { %2882 = vrcp.f32 %v1578_v29 }
 0xa70   : > { %v1586_v30 = vpop.permute.xlu0 %1585 }
 0xa71   : > { %v1591_v31 = vsel %vm1128_vm12, %v1586_v30, 0 }
 0xa72   : > { %2725 = vmatpush3.bf16.msra.mxu1 %v1591_v31  ;;  %v2840_v31 = vld [vmem:[%s3078_s19] sm:$0xff]  }
 0xa73   : > { %v2881_v32 = vpop.eup %2880  ;;  %2736 = vmatprep.subr.bf16.mxu1 %v2925_v37 }
 0xa74   : > { %v1581_v34 = vmul.f32 %v2881_v32, %v2877_v24  ;;  %v1693_v43 = vpop.permute.xlu0 %1692  ;;  %v2841_v32 = vld [vmem:[%s3078_s19 + $0x8] sm:$0xff]  }
 0xa76   : > { %v1583_v35 = vpack.c.bf16 %v1581_v34, %v1581_v34 }
 0xa77   : > { %v2883_v36 = vpop.eup %2882 }
 0xa78   : > { %v1582_v38 = vmul.f32 %v2883_v36, %v2879_v26  ;;  %2727 = vmatmul.mubr.msk.bf16.vlgmr.msra.gmra.mrb[16].mxu1 %vm999_vm11, %v1583_v35 }
 0xa79   : > { %2738 = vmatprep.mubr.msk.bf16.mxu1 %vm2926_vm6, %v2925_v37 }
 0xa7a   : > { %v1584_v41 = vpack.c.bf16 %v1582_v38, %v1582_v38 }
 0xa7b   : > { %2737 = vmatpush3.bf16.xpose.msra.mxu1 %v1700_v40 }
 0xa7c   : > { %2733 = vmatmul.mubr.msk.bf16.vlgmr.msra.gmra.mrb[28].mxu0 %vm999_vm11, %v1584_v41  ;;  %2748 = vmatprep.subr.bf16.mxu1 %v2925_v37 }
 0xa7d   : > { %2743 = vmatpush3.bf16.xpose.msra.mxu0 %v1750_v42  ;;  %2744 = vmatprep.mubr.msk.bf16.mxu0 %vm2926_vm6, %v2925_v37 }
 0xa7e   : > { %2754 = vmatprep.subr.bf16.mxu0 %v2925_v37 }
 0xa82   : > { %2739 = vmatmul.mubr.msk.bf16.vlgmr.msra.gmra.mrb[20].mxu1 %vm999_vm11, %v1693_v43 }
 0xa83   : > { %2750 = vmatprep.mubr.msk.bf16.mxu1 %vm2926_vm6, %v2925_v37 }
 0xa84   : > { %2745 = vmatmul.mubr.msk.bf16.vlgmr.msra.gmra.mrb[32].mxu0 %vm999_vm11, %v1743_v44 }
 0xa85   : > { %2756 = vmatprep.mubr.msk.bf16.mxu0 %vm2926_vm6, %v2925_v37 }
 0xb4b   : > { %v1627_v45 = vpop.f32.mrb[16].mxu1 }
 0xb4c   : > { %v2728_v46 = vpop.f32.mrb[17].mxu1 }
 0xb4d   : > { %v1630_v47 = vpop.f32.mrb[18].mxu1 }
 0xb4e   : > { %v2729_v48 = vpop.f32.mrb[19].mxu1  ;;  %v2555_v47 = vld [vmem:[%s3463_s0] ss:$0 sm:$0xff]  ;;  %s3466_s0 = sld [smem:[#allocation10_spill]] (!%p2574_p5) }
 0xb4f   : > { %v1675_v49 = vpop.f32.mrb[28].mxu0 }
 0xb50   : > { %v2734_v50 = vpop.f32.mrb[29].mxu0 }
 0xb51   : > { %v1678_v51 = vpop.f32.mrb[30].mxu0 }
 0xb52   : > { %v2735_v52 = vpop.f32.mrb[31].mxu0 }
 0xb55   : > { %v1736_v54 = vpop.f32.mrb[20].mxu1 }
 0xb56   : > { %v1792_v55 = vmul.f32 0.35355338, %v1736_v54  ;;  %v2740_v56 = vpop.f32.mrb[21].mxu1 }
 0xb57   : > { %v1739_v58 = vpop.f32.mrb[22].mxu1  ;;  %v1786_v59 = vpop.f32.mrb[32].mxu0 }
 0xb58   : > { %v1793_v60 = vmul.f32 0.35355338, %v1786_v59  ;;  %v2741_v61 = vpop.f32.mrb[23].mxu1  ;;  %v2746_v62 = vpop.f32.mrb[33].mxu0  ;;  %v1794_v63 = vadd.f32 %v1792_v55, %v3194_v16 }
 0xb59   : > { %v1789_v0 = vpop.f32.mrb[34].mxu0 }
 0xb5a   : > { %v2747_v1 = vpop.f32.mrb[35].mxu0  ;;  %v1796_v2 = vsel %vm999_vm11, %v1794_v63, -inf  ;;  %v1795_v3 = vadd.f32 %v1793_v60, %v3194_v16 }
 0xb5b   : > { %1797 = vmax.xlane.f32.xlu0 %v1796_v2 }
 0xb5c   : > { %v1799_v4 = vsel %vm999_vm11, %v1795_v3, -inf }
 0xb5d   : > { %1800 = vmax.xlane.f32.xlu1 %v1799_v4  ;;  %v2842_v4 = vld [vmem:[%s3095_s9] sm:$0xff]  }
 0xb6e   : > { %1868 = vrot.lane.b32.xlu1 %v3175_v10, %s2937_s24 }
 0xb72   : > { %1448 = vrot.lane.b32.xlu1 %v3262_v53, %s2938_s23 }
 0xb76   : > { %1450 = vrot.lane.b32.xlu1 %v3264_v57, %s2938_s23 }
 0xb7a   : > { %1685 = vrot.lane.b32.xlu1 %v1675_v49, %s2939_s26 }
 0xbe8   : > { %v1798_v5 = vpop.xlane.xlu0 %1797 }
 0xbe9   : > { %v1802_v6 = vsub.f32 %v1794_v63, %v1798_v5  ;;  %v2843_v5 = vld [vmem:[%s3095_s9 + $0x8] sm:$0xff]  }
 0xbea   : > { %v1801_v8 = vpop.xlane.xlu1 %1800 }
 0xbeb   : > { %v1804_v9 = vmul.f32 1.442695, %v1802_v6  ;;  %v1803_v16 = vsub.f32 %v1795_v3, %v1801_v8  ;;  %v2844_v6 = vld [vmem:[%s3105_s2] sm:$0xff]   ;;  %v2845_v8 = vld [vmem:[%s3105_s2 + $0x8] sm:$0xff]  }
 0xbed   : > { %2884 = vpow2.f32 %v1804_v9  ;;  %v1806_v11 = vmul.f32 1.442695, %v1803_v16 }
 0xbee   : > { %v1869_v12 = vpop.permute.xlu1 %1868 }
 0xbef   : > { %2886 = vpow2.f32 %v1806_v11  ;;  %v1874_v13 = vsel %vm1128_vm12, %v1869_v12, 0 }
 0xbf0   : > { %2755 = vmatpush3.bf16.msra.mxu0 %v1874_v13 }
 0xbf1   : > { %2768 = vmatprep.subr.bf16.mxu0 %v2925_v37 }
 0xbf2   : > { %v1449_v10 = vpop.permute.xlu1 %1448 }
 0xbf3   : > { %1455 = vst.msk [vmem:[#allocation3] sm:$0xff] %vm1454_vm13, %v1449_v10 }
 0xbf6   : > { %v1451_v53 = vpop.permute.xlu1 %1450 }
 0xbf7   : > { %v2885_v57 = vpop.eup %2884  ;;  %1456 = vst.msk [vmem:[#allocation3 + $0x8] sm:$0xff] %vm1454_vm13, %v1451_v53 }
 0xbf8   : > { %v1808_v14 = vsel %vm999_vm11, %v2885_v57, 0.0 }
 0xbf9   : > { %v2887_v15 = vpop.eup %2886  ;;  %1809 = vadd.xlane.f32.xlu0 %v1808_v14 }
 0xbfa   : > { %v1686_v17 = vpop.permute.xlu1 %1685  ;;  %v1811_v18 = vsel %vm999_vm11, %v2887_v15, 0.0 }
 0xbfb   : > { %1691 = vst.msk [vmem:[#allocation3 + $0x8] sm:$0xff] %vm1689_vm14, %v1686_v17 }
 0xbfd   : > { %1812 = vadd.xlane.f32.xlu0 %v1811_v18 }
 0xc13   : > { %1820 = vrot.lane.b32.xlu0 %v3173_v7, %s2937_s24 }
 0xc17   : > { %1683 = vrot.lane.b32.xlu0 %v1627_v45, %s2939_s26 }
 0xc86   : > { %v1810_v19 = vpop.xlane.xlu0 %1809 }
 0xc87   : > { %2888 = vrcp.f32 %v1810_v19 }
 0xc8a   : > { %v1813_v20 = vpop.xlane.xlu0 %1812 }
 0xc8b   : > { %2890 = vrcp.f32 %v1813_v20 }
 0xc8e   : > { %v1821_v21 = vpop.permute.xlu0 %1820 }
 0xc8f   : > { %v1826_v24 = vsel %vm1128_vm12, %v1821_v21, 0 }
 0xc90   : > { %2749 = vmatpush3.bf16.msra.mxu1 %v1826_v24 }
 0xc91   : > { %v2889_v25 = vpop.eup %2888  ;;  %2760 = vmatprep.subr.bf16.mxu1 %v2925_v37 }
 0xc92   : > { %v1816_v26 = vmul.f32 %v2889_v25, %v2885_v57  ;;  %v1684_v27 = vpop.permute.xlu0 %1683 }
 0xc93   : > { %1690 = vst.msk [vmem:[#allocation3] sm:$0xff] %vm1689_vm14, %v1684_v27  ;;  %v2559_v27 = vld [vmem:[%s740_s4] ss:$0 sm:$0xff] }
 0xc94   : > { %v1818_v28 = vpack.c.bf16 %v1816_v26, %v1816_v26 }
 0xc95   : > { %v2891_v7 = vpop.eup %2890 }
 0xc96   : > { %v1817_v29 = vmul.f32 %v2891_v7, %v2887_v15  ;;  %2751 = vmatmul.mubr.msk.bf16.vlgmr.msra.gmra.mrb[24].mxu1 %vm999_vm11, %v1818_v28 }
 0xc97   : > { %2764 = vmatprep.mubr.msk.bf16.mxu1 %vm2926_vm6, %v2925_v37  ;;  %2761 = vmatpush3.bf16.msra.mxu1 %v2840_v31 }
 0xc98   : > { %v1819_v30 = vpack.c.bf16 %v1817_v29, %v1817_v29  ;;  %2762 = vmatprep.subr.bf16.mxu1 %v2925_v37 }
 0xc9a   : > { %2757 = vmatmul.mubr.msk.bf16.vlgmr.msra.gmra.mrb[36].mxu0 %vm999_vm11, %v1819_v30  ;;  %v2560_v30 = vld [vmem:[%s743_s27] ss:$0 sm:$0xff] }
 0xc9b   : > { %2772 = vmatprep.mubr.msk.bf16.mxu0 %vm2926_vm6, %v2925_v37  ;;  %2763 = vmatpush3.bf16.msra.mxu1 %v2841_v32 }
 0xc9c   : > { %2776 = vmatprep.subr.bf16.mxu1 %v2925_v37  ;;  %2769 = vmatpush3.bf16.msra.mxu0 %v2842_v4 }
 0xc9d   : > { %2770 = vmatprep.subr.bf16.mxu0 %v2925_v37 }
 0xca0   : > { %2771 = vmatpush3.bf16.msra.mxu0 %v2843_v5 }
 0xd69   : > { %v1862_v33 = vpop.f32.mrb[24].mxu1 }
 0xd6a   : > { %1918 = vrot.lane.b32.xlu0 %v1862_v33, %s2940_s25  ;;  %v2752_v34 = vpop.f32.mrb[25].mxu1 }
 0xd6b   : > { %v1865_v35 = vpop.f32.mrb[26].mxu1 }
 0xd6c   : > { %v2753_v36 = vpop.f32.mrb[27].mxu1  ;;  %v2846_v35 = vld [vmem:[%s3105_s2 + $0x10] sm:$0xff]  }
 0xd6d   : > { %v1910_v38 = vpop.f32.mrb[36].mxu0  ;;  %v2847_v36 = vld [vmem:[%s3105_s2 + $0x18] sm:$0xff]  }
 0xd6e   : > { %1920 = vrot.lane.b32.xlu1 %v1910_v38, %s2940_s25  ;;  %v2758_v39 = vpop.f32.mrb[37].mxu0  ;;  %v2848_v38 = vld [vmem:[%s3105_s2 + $0x20] sm:$0xff]   ;;  %s3465_s25 = sld [smem:[#allocation9_spill]] (!%p2574_p5) }
 0xd6f   : > { %v1913_v40 = vpop.f32.mrb[38].mxu0  ;;  %v2849_v39 = vld [vmem:[%s3105_s2 + $0x28] sm:$0xff]  }
 0xd70   : > { %v2759_v41 = vpop.f32.mrb[39].mxu0  ;;  %v2850_v40 = vld [vmem:[%s3105_s2 + $0x30] sm:$0xff]  }
 0xd71   : > { %v2851_v41 = vld [vmem:[%s3105_s2 + $0x38] sm:$0xff]  }
 0xddc   : > { %v1919_v42 = vpop.permute.xlu0 %1918 }
 0xddd   : > { %1925 = vst.msk [vmem:[#allocation3] sm:$0xff] %vm1924_vm15, %v1919_v42  ;;  %v2561_v42 = vld [vmem:[%s751_s11] ss:$0 sm:$0xff] }
 0xde0   : > { %v1921_v43 = vpop.permute.xlu1 %1920 }
 0xde1   : > { %1926 = vst.msk [vmem:[#allocation3 + $0x8] sm:$0xff] %vm1924_vm15, %v1921_v43 }
 0xde4   : > { %v1927_v44 = vld [vmem:[#allocation3] sm:$0xff] }
 0xde8   : > { %v1928_v45 = vld [vmem:[#allocation3 + $0x8] sm:$0xff] }
 0xde9   : > { %v1929_v46 = vpack.c.bf16 %v1928_v45, %v1927_v44 }
 0xdeb   : > { %2765 = vmatmul.mubr.msk.bf16.vlgmr.msra.gmra.mrb[28].mxu1 %vm867_vm5, %v1929_v46 }
 0xdec   : > { %2792 = vmatprep.mubr.msk.bf16.mxu1 %vm2926_vm6, %v2925_v37  ;;  %2777 = vmatpush3.bf16.msra.mxu1 %v2844_v6 }
 0xded   : > { %2778 = vmatprep.subr.bf16.mxu1 %v2925_v37 }
 0xdf0   : > { %2779 = vmatpush3.bf16.msra.mxu1 %v2845_v8 }
 0xdf1   : > { %2780 = vmatprep.subr.bf16.mxu1 %v2925_v37 }
 0xdf4   : > { %2781 = vmatpush3.bf16.msra.mxu1 %v2846_v35 }
 0xdf5   : > { %2782 = vmatprep.subr.bf16.mxu1 %v2925_v37 }
 0xdf8   : > { %2783 = vmatpush3.bf16.msra.mxu1 %v2847_v36 }
 0xdf9   : > { %2784 = vmatprep.subr.bf16.mxu1 %v2925_v37 }
 0xdfc   : > { %2785 = vmatpush3.bf16.msra.mxu1 %v2848_v38  ;;  %v2575_v38 = vld [vmem:[%s3465_s25] ss:$0 sm:$0xff] (!%p2574_p5) }
 0xdfd   : > { %2786 = vmatprep.subr.bf16.mxu1 %v2925_v37 }
 0xe00   : > { %2787 = vmatpush3.bf16.msra.mxu1 %v2849_v39 }
 0xe01   : > { %2788 = vmatprep.subr.bf16.mxu1 %v2925_v37 }
 0xe04   : > { %2789 = vmatpush3.bf16.msra.mxu1 %v2850_v40 }
 0xe05   : > { %2790 = vmatprep.subr.bf16.mxu1 %v2925_v37 }
 0xe08   : > { %2791 = vmatpush3.bf16.msra.mxu1 %v2851_v41 }
 0xebe   : > { %v1990_v48 = vpop.f32.mrb[28].mxu1 }
 0xebf   : > { %v1991_v49 = vadd.f32 %v2555_v47, %v1990_v48  ;;  %v2766_v50 = vpop.f32.mrb[29].mxu1 }
 0xec0   : > { %v1993_v51 = vpop.f32.mrb[30].mxu1 }
 0xec1   : > { %v3335_v52 = vadd.f32 %v1991_v49, %v3133_v22  ;;  %v1994_v54 = vadd.f32 %v2555_v47, %v1993_v51  ;;  %v2767_v55 = vpop.f32.mrb[31].mxu1 }
 0xec3   : > { %v3338_v56 = vadd.f32 %v1994_v54, %v3135_v23  ;;  %v2001_v58 = vsel %vm867_vm5, %v3335_v52, 0.0 }
 0xec4   : > { %2002 = vadd.xlane.f32.xlu0 %v2001_v58 }
 0xec5   : > { %v2004_v59 = vsel %vm867_vm5, %v3338_v56, 0.0 }
 0xec6   : > { %2005 = vadd.xlane.f32.xlu1 %v2004_v59 }
 0xf51   : > { %v2003_v60 = vpop.xlane.xlu0 %2002 }
 0xf52   : > { %v2007_v61 = vmul.f32 0.03125, %v2003_v60 }
 0xf53   : > { %v2006_v22 = vpop.xlane.xlu1 %2005 }
 0xf54   : > { %v2009_v62 = vsub.f32 %v3335_v52, %v2007_v61  ;;  %v2008_v63 = vmul.f32 0.03125, %v2006_v22 }
 0xf56   : > { %v2010_v23 = vsub.f32 %v3338_v56, %v2008_v63  ;;  %v2011_v0 = vmul.f32 %v2009_v62, %v2009_v62 }
 0xf58   : > { %v2013_v1 = vsel %vm867_vm5, %v2011_v0, 0.0  ;;  %v2012_v2 = vmul.f32 %v2010_v23, %v2010_v23 }
 0xf59   : > { %2014 = vadd.xlane.f32.xlu0 %v2013_v1 }
 0xf5a   : > { %v2016_v3 = vsel %vm867_vm5, %v2012_v2, 0.0 }
 0xf5d   : > { %2017 = vadd.xlane.f32.xlu0 %v2016_v3 }
 0xfe6   : > { %v2015_v9 = vpop.xlane.xlu0 %2014 }
 0xfe7   : > { %v2019_v16 = vmul.f32 0.032258064, %v2015_v9 }
 0xfe9   : > { %2892 = vrsqrt.f32 %v2019_v16  ;;  %vm2023_vm0 = vcmp.eq.f32.partialorder %v2019_v16, inf  ;;  %v2026_v53 = vand.u32 2147483648, %v2019_v16  ;;  %vm2025_vm1 = vcmp.eq.f32.partialorder %v2019_v16, 0.0 }
 0xfea   : > { %v2018_v11 = vpop.xlane.xlu0 %2017 }
 0xfeb   : > { %v2020_v12 = vmul.f32 0.032258064, %v2018_v11 }
 0xfed   : > { %2894 = vrsqrt.f32 %v2020_v12  ;;  %vm2030_vm2 = vcmp.eq.f32.partialorder %v2020_v12, inf  ;;  %v2033_v19 = vand.u32 2147483648, %v2020_v12  ;;  %vm2032_vm3 = vcmp.eq.f32.partialorder %v2020_v12, 0.0 }
 0xff3   : > { %v2893_v13 = vpop.eup %2892 }
 0xff4   : > { %v2022_v10 = vmul.f32 %v2893_v13, %v2019_v16 }
 0xff6   : > { %v2024_v57 = vsel %vm2023_vm0, %v2019_v16, %v2022_v10 }
 0xff7   : > { %v2895_v14 = vpop.eup %2894  ;;  %v2027_v15 = vsel %vm2025_vm1, %v2026_v53, %v2024_v57 }
 0xff8   : > { %v2035_v17 = vadd.f32 1e-05, %v2027_v15  ;;  %v2029_v18 = vmul.f32 %v2895_v14, %v2020_v12  ;;  %v2941_v15 = vmov (!%p2574_p5), 0.0  }
 0xff9   : > { %2796 = vmatprep.subr.bf16.mxu0 (!%p2574_p5), %v2941_v15 }
 0xffa   : > { %2896 = vrcp.f32 %v2035_v17  ;;  %v2031_v20 = vsel %vm2030_vm2, %v2020_v12, %v2029_v18 }
 0xffb   : > { %v2034_v21 = vsel %vm2032_vm3, %v2033_v19, %v2031_v20 }
 0xffc   : > { %v2036_v24 = vadd.f32 1e-05, %v2034_v21 }
 0xffe   : > { %2898 = vrcp.f32 %v2036_v24 }
0x1004   : > { %v2897_v25 = vpop.eup %2896 }
0x1005   : > { %v2039_v26 = vmul.f32 %v2897_v25, %v2009_v62  ;;  %v2565_v62 = vld [vmem:[%s759_s3] ss:$0 sm:$0xff]  ;;  %s3464_s3 = sld [smem:[#allocation11_spill]] (!%p2574_p5) }
0x1007   : > { %v2047_v29 = vmul.f32 %v2559_v27, %v2039_v26 }
0x1008   : > { %v2899_v28 = vpop.eup %2898 }
0x1009   : > { %v2040_v7 = vmul.f32 %v2899_v28, %v2010_v23  ;;  %v2055_v32 = vadd.f32 %v2560_v30, %v2047_v29 }
0x100b   : > { %v2048_v31 = vmul.f32 %v2559_v27, %v2040_v7  ;;  %v2904_v14 = vld [vmem:[%s3464_s3] sm:$0xff] (!%p2574_p5)   ;;  %v2905_v17 = vld [vmem:[%s3464_s3 + $0x8] sm:$0xff] (!%p2574_p5)  }
0x100d   : > { %v2056_v33 = vadd.f32 %v2560_v30, %v2048_v31 }
0x100f   : > { %v2057_v34 = vpack.c.bf16 %v2056_v33, %v2055_v32 }
0x1011   : > { %2773 = vmatmul.mubr.msk.bf16.vlgmr.msra.gmra.mrb[40].mxu0 %vm867_vm5, %v2057_v34 }
0x1012   : > { %2800 = vmatprep.mubr.msk.bf16.mxu0 (!%p2574_p5), %vm2942_vm4, %v2941_v15  ;;  %2797 = vmatpush3.bf16.msra.mxu0 (!%p2574_p5), %v2904_v14 }
0x1013   : > { %2798 = vmatprep.subr.bf16.mxu0 (!%p2574_p5), %v2941_v15 }
0x1016   : > { %2799 = vmatpush3.bf16.msra.mxu0 (!%p2574_p5), %v2905_v17 }
0x10e4   : > { %v2118_v43 = vpop.f32.mrb[40].mxu0 }
0x10e5   : > { %v2119_v44 = vadd.f32 %v2561_v42, %v2118_v43  ;;  %v2774_v45 = vpop.f32.mrb[41].mxu0 }
0x10e6   : > { %v2121_v46 = vpop.f32.mrb[42].mxu0 }
0x10e7   : > { %v2127_v47 = vmul.f32 0.70710677, %v2119_v44  ;;  %v2122_v48 = vadd.f32 %v2561_v42, %v2121_v46  ;;  %v2775_v49 = vpop.f32.mrb[43].mxu0  ;;  %v2125_v55 = vmul.f32 0.5, %v2119_v44  ;;  %v2576_v42 = vld [vmem:[%s3466_s0] ss:$0 sm:$0xff] (!%p2574_p5) }
0x10e9   : > { %2900 = verf.f32 %v2127_v47  ;;  %v2128_v50 = vmul.f32 0.70710677, %v2122_v48  ;;  %v2126_v58 = vmul.f32 0.5, %v2122_v48 }
0x10eb   : > { %2902 = verf.f32 %v2128_v50 }
0x10f3   : > { %v2901_v51 = vpop.eup %2900 }
0x10f4   : > { %v2131_v37 = vadd.f32 1.0, %v2901_v51 }
0x10f5   : > { %v2903_v54 = vpop.eup %2902 }
0x10f6   : > { %v2132_v59 = vadd.f32 1.0, %v2903_v54  ;;  %v2133_v60 = vmul.f32 %v2131_v37, %v2125_v55 }
0x10f8   : > { %v2134_v61 = vmul.f32 %v2132_v59, %v2126_v58 }
0x10fa   : > { %v2135_v22 = vpack.c.bf16 %v2134_v61, %v2133_v60 }
0x10fc   : > { %2793 = vmatmul.mubr.bf16.vlgmr.msra.gmra.mrb[32].mxu1 %v2135_v22 }
0x11cf   : > { %v2241_v63 = vpop.f32.mrb[32].mxu1 }
0x11d0   : > { %v2242_v23 = vadd.f32 %v2565_v62, %v2241_v63  ;;  %v2794_v0 = vpop.f32.mrb[33].mxu1  ;;  %2255 = sbr.rel (%p2574_p5) target bundleno = 5113 (0x13f9), region = 104 }
0x11d1   : > { %v2244_v1 = vpop.f32.mrb[34].mxu1 }
0x11d2   : > { %v2248_v2 = vadd.f32 %v2242_v23, %v3335_v52  ;;  %v2245_v3 = vadd.f32 %v2565_v62, %v2244_v1  ;;  %v2795_v4 = vpop.f32.mrb[35].mxu1 }
0x11d4   : > { %2250 = vst.msk [vmem:[#allocation2] sm:$0xff] %vm867_vm5, %v2248_v2  ;;  %v2249_v5 = vadd.f32 %v2245_v3, %v3338_v56  ;;  %v2258_v6 = vsel (!%p2574_p5), %vm867_vm5, %v2248_v2, 0.0 }
0x11d5   : > { %2259 = vadd.xlane.f32.xlu0 (!%p2574_p5), %v2258_v6 }
0x11d6   : > { %2251 = vst.msk [vmem:[#allocation2 + $0x8] sm:$0xff] %vm867_vm5, %v2249_v5  ;;  %v2261_v8 = vsel (!%p2574_p5), %vm867_vm5, %v2249_v5, 0.0 }
0x11d9   : > { %2262 = vadd.xlane.f32.xlu0 %v2261_v8 }
0x1262   : > { %v2260_v9 = vpop.xlane.xlu0 %2259 }
0x1263   : > { %v2264_v16 = vmul.f32 0.03125, %v2260_v9 }
0x1265   : > { %v2266_v52 = vsub.f32 %v2248_v2, %v2264_v16 }
0x1266   : > { %v2263_v11 = vpop.xlane.xlu0 %2262 }
0x1267   : > { %v2265_v12 = vmul.f32 0.03125, %v2263_v11  ;;  %v2268_v13 = vmul.f32 %v2266_v52, %v2266_v52 }
0x1269   : > { %v2267_v10 = vsub.f32 %v2249_v5, %v2265_v12  ;;  %v2270_v56 = vsel %vm867_vm5, %v2268_v13, 0.0 }
0x126a   : > { %2271 = vadd.xlane.f32.xlu1 %v2270_v56 }
0x126b   : > { %v2269_v53 = vmul.f32 %v2267_v10, %v2267_v10 }
0x126d   : > { %v2273_v57 = vsel %vm867_vm5, %v2269_v53, 0.0 }
0x126e   : > { %2274 = vadd.xlane.f32.xlu1 %v2273_v57 }
0x12f7   : > { %v2272_v18 = vpop.xlane.xlu1 %2271 }
0x12f8   : > { %v2276_v19 = vmul.f32 0.032258064, %v2272_v18 }
0x12fa   : > { %2906 = vrsqrt.f32 %v2276_v19  ;;  %vm2280_vm6 = vcmp.eq.f32.partialorder %v2276_v19, inf  ;;  %v2283_v26 = vand.u32 2147483648, %v2276_v19  ;;  %vm2282_vm7 = vcmp.eq.f32.partialorder %v2276_v19, 0.0 }
0x12fb   : > { %v2275_v20 = vpop.xlane.xlu1 %2274 }
0x12fc   : > { %v2277_v21 = vmul.f32 0.032258064, %v2275_v20 }
0x12fe   : > { %2908 = vrsqrt.f32 %v2277_v21  ;;  %vm2287_vm8 = vcmp.eq.f32.partialorder %v2277_v21, inf  ;;  %v2290_v31 = vand.u32 2147483648, %v2277_v21  ;;  %vm2289_vm9 = vcmp.eq.f32.partialorder %v2277_v21, 0.0 }
0x1304   : > { %v2907_v24 = vpop.eup %2906 }
0x1305   : > { %v2279_v25 = vmul.f32 %v2907_v24, %v2276_v19 }
0x1307   : > { %v2281_v27 = vsel %vm2280_vm6, %v2276_v19, %v2279_v25 }
0x1308   : > { %v2909_v28 = vpop.eup %2908  ;;  %v2284_v7 = vsel %vm2282_vm7, %v2283_v26, %v2281_v27 }
0x1309   : > { %v2292_v29 = vadd.f32 1e-05, %v2284_v7  ;;  %v2286_v30 = vmul.f32 %v2909_v28, %v2277_v21 }
0x130b   : > { %v2288_v32 = vsel %vm2287_vm8, %v2277_v21, %v2286_v30  ;;  %2910 = vrcp.f32 %v2292_v29 }
0x130c   : > { %v2291_v33 = vsel %vm2289_vm9, %v2290_v31, %v2288_v32 }
0x130d   : > { %v2293_v34 = vadd.f32 1e-05, %v2291_v33 }
0x130f   : > { %2912 = vrcp.f32 %v2293_v34 }
0x1315   : > { %v2911_v35 = vpop.eup %2910 }
0x1316   : > { %v2296_v36 = vmul.f32 %v2911_v35, %v2266_v52 }
0x1318   : > { %v2304_v41 = vmul.f32 %v2575_v38, %v2296_v36 }
0x1319   : > { %v2913_v39 = vpop.eup %2912 }
0x131a   : > { %v2297_v40 = vmul.f32 %v2913_v39, %v2267_v10  ;;  %v2312_v44 = vadd.f32 %v2576_v42, %v2304_v41 }
0x131c   : > { %v2305_v43 = vmul.f32 %v2575_v38, %v2297_v40 }
0x131e   : > { %v2313_v45 = vadd.f32 %v2576_v42, %v2305_v43 }
0x1320   : > { %v2314_v46 = vpack.c.bf16 %v2313_v45, %v2312_v44 }
0x1322   : > { %2801 = vmatmul.mubr.msk.bf16.vlgmr.msra.gmra.mrb[0].mxu0 %vm867_vm5, %v2314_v46 }
0x13f5   : > { %v2368_v47 = vpop.f32.mrb[0].mxu0 }
0x13f6   : > { %2375 = vst [vmem:[%s3467_s5] sm:$0xff] %v2368_v47  ;;  %v2802_v48 = vpop.f32.mrb[1].mxu0 }
0x13f7   : > { %v2371_v49 = vpop.f32.mrb[2].mxu0 }
0x13f8   : > { %2376 = vst [vmem:[%s3467_s5 + $0x8] sm:$0xff] %v2371_v49  ;;  %v2803_v50 = vpop.f32.mrb[3].mxu0 }
0x13f9 PF: > { %s3468_s27 = sld [smem:[#allocation4_spill]] }
0x13ff   : > { %s29_s0 = sadd.s32 1, %s3468_s27  }
0x1400   : > { %p26_p6 = scmp.ge.s32.totalorder %s29_s0, 4  }
0x1402   :  { %28 = sbr.rel (!%p26_p6) target bundleno = 11 (0xb), region = 163 }

</bundles_post_ra>
